<compile_context>
chip_gen: v5e
topology: v5e:2x2
jax: 0.10.0
libtpu: 0.0.40
codegen_flags: <defaults>
</compile_context>

<pallas_src>
import functools

import jax
import jax.numpy as jnp
from jax import lax
from jax.experimental import pallas as pl
from jax.experimental.pallas import tpu as pltpu


def _mat3_mul(A, Bm):
    """Row-major 3x3 matmul on length-9 lists of scalars / (1, Bt) lane-vectors."""
    C = []
    for r in range(3):
        for c in range(3):
            acc = A[3 * r + 0] * Bm[0 * 3 + c]
            acc = acc + A[3 * r + 1] * Bm[1 * 3 + c]
            acc = acc + A[3 * r + 2] * Bm[2 * 3 + c]
            C.append(acc)
    return C


def _skeleton_kernel(jmat_ref, pose_ref, trans_ref, out_ref, *, parents, Jn):
    # jmat_ref : (Jn*12,)   SMEM   rest-pose top 3x4 per joint (row-major)
    # pose_ref : (3*Jn, Bt) VMEM   axis-angle, component-major, lane = batch
    # trans_ref: (3, Bt)    VMEM   global translation
    # out_ref  : (3*Jn, Bt) VMEM   posed joint positions (same layout as pose)
    has_child = frozenset(parents[1:])

    # ---- Rodrigues for all joints at once (sublane = joint, lane = batch) ----
    rx = pose_ref[pl.ds(0 * Jn, Jn), :]          # (Jn, Bt)
    ry = pose_ref[pl.ds(1 * Jn, Jn), :]
    rz = pose_ref[pl.ds(2 * Jn, Jn), :]

    sumsq = rx * rx + ry * ry + rz * rz + 1e-16
    inv_theta = lax.rsqrt(sumsq)                 # EUP slot (free next to VALU)
    theta = sumsq * inv_theta                    # == sqrt(sumsq)
    ux = rx * inv_theta
    uy = ry * inv_theta
    uz = rz * inv_theta
    c = jnp.cos(theta)
    s = jnp.sin(theta)
    oc = 1.0 - c

    # 9 rotation entries, each (Jn, Bt); row-major 3x3.
    R = [
        c + oc * ux * ux, oc * ux * uy - s * uz, oc * ux * uz + s * uy,
        oc * uy * ux + s * uz, c + oc * uy * uy, oc * uy * uz - s * ux,
        oc * uz * ux - s * uy, oc * uz * uy + s * ux, c + oc * uz * uz,
    ]

    tx = trans_ref[0:1, :]
    ty = trans_ref[1:2, :]
    tz = trans_ref[2:3, :]

    # ---- sequential kinematic chain, affine 3x4 composition ----
    resR = [None] * Jn           # 9 entries of (1, Bt) per non-leaf joint
    resT = [None] * Jn           # 3 entries ((1, Bt) or scalar) per joint

    for j in range(Jn):          # static unroll: Jn is small
        JR = [jmat_ref[j * 12 + 4 * r + col] for r in range(3) for col in range(3)]
        Jt = [jmat_ref[j * 12 + 4 * r + 3] for r in range(3)]
        need_rot = j in has_child

        if j == 0:
            # root: global = J_0 @ to4x4(R_0); translation column is just Jt.
            gT = Jt              # scalars; broadcast where used
            if need_rot:
                Rj = [R[k][j:j + 1, :] for k in range(9)]
                resR[j] = _mat3_mul(JR, Rj)
        else:
            pR = resR[parents[j]]
            pT = resT[parents[j]]
            gT = [pR[3 * r + 0] * Jt[0] + pR[3 * r + 1] * Jt[1]
                  + pR[3 * r + 2] * Jt[2] + pT[r] for r in range(3)]
            if need_rot:
                Rj = [R[k][j:j + 1, :] for k in range(9)]
                localR = _mat3_mul(JR, Rj)
                resR[j] = _mat3_mul(pR, localR)

        resT[j] = gT

        # Stream posed position rows immediately (lane-dense (1, Bt) stores).
        out_ref[0 * Jn + j:0 * Jn + j + 1, :] = gT[0] + tx
        out_ref[1 * Jn + j:1 * Jn + j + 1, :] = gT[1] + ty
        out_ref[2 * Jn + j:2 * Jn + j + 1, :] = gT[2] + tz


def _batch_tile(Bp):
    """Lane-dense batch tile. Bp must be a multiple of 128.

    Largest multiple-of-128 divisor of Bp up to 1024, preferring >=2 grid steps
    (v7x megacore) whenever Bp >= 256.
    """
    cands = [bt for bt in range(128, min(Bp, 1024) + 1, 128) if Bp % bt == 0]
    if Bp >= 256:
        return max(bt for bt in cands if Bp // bt >= 2)
    return max(cands)


def skeleton_forward(pose, trans, jmat, parents):
    """pose: (B, Jn, 3) axis-angle, trans: (B, 3), jmat: (Jn, 4, 4).

    Returns posed joint positions (B, Jn, 3), matching Skeleton.forward.
    jmat is assumed to have homogeneous bottom row [0,0,0,1] (rest transforms).
    """
    B, Jn, _ = pose.shape
    Bp = ((B + 127) // 128) * 128

    pose_f = pose.astype(jnp.float32)
    trans_f = trans.astype(jnp.float32)
    if Bp != B:
        pose_f = jnp.pad(pose_f, ((0, Bp - B), (0, 0), (0, 0)))
        trans_f = jnp.pad(trans_f, ((0, Bp - B), (0, 0)))

    # Component-major, lane = batch: (3*Jn, Bp).
    pose_cm = jnp.transpose(pose_f, (2, 1, 0)).reshape(3 * Jn, Bp)
    trans_t = jnp.transpose(trans_f, (1, 0))                              # (3, Bp)
    jmat_flat = jmat.astype(jnp.float32)[:, :3, :].reshape(Jn * 12)       # top 3x4

    bt = _batch_tile(Bp)
    grid = (Bp // bt,)
    kernel = functools.partial(
        _skeleton_kernel, parents=tuple(int(p) for p in parents), Jn=Jn
    )

    out_cm = pl.pallas_call(
        kernel,
        out_shape=jax.ShapeDtypeStruct((3 * Jn, Bp), jnp.float32),
        grid_spec=pltpu.PrefetchScalarGridSpec(
            num_scalar_prefetch=0,
            grid=grid,
            in_specs=[
                pl.BlockSpec((Jn * 12,), lambda b: (0,),
                             memory_space=pltpu.MemorySpace.SMEM),        # J (rest)
                pl.BlockSpec((3 * Jn, bt), lambda b: (0, b)),             # pose
                pl.BlockSpec((3, bt), lambda b: (0, b)),                  # trans
            ],
            out_specs=pl.BlockSpec((3 * Jn, bt), lambda b: (0, b)),
        ),
        compiler_params=pltpu.CompilerParams(dimension_semantics=("parallel",)),
    )(jmat_flat, pose_cm, trans_t)

    out = jnp.transpose(out_cm.reshape(3, Jn, Bp), (2, 1, 0))
    return out[:B]


def skeleton_reference(pose, trans, jmat, parents):
    """Pure-JAX reference (mirrors the PyTorch forward)."""
    B, Jn, _ = pose.shape
    r = pose.reshape(B * Jn, 3).astype(jnp.float32)
    theta = jnp.sqrt(jnp.sum(r * r, axis=-1) + 1e-16)
    u = r / theta[:, None]
    ux, uy, uz = u[:, 0], u[:, 1], u[:, 2]
    c = jnp.cos(theta)
    s = jnp.sin(theta)
    oc = 1.0 - c
    R = jnp.stack(
        [c + oc * ux * ux, oc * ux * uy - s * uz, oc * ux * uz + s * uy,
         oc * uy * ux + s * uz, c + oc * uy * uy, oc * uy * uz - s * ux,
         oc * uz * ux - s * uy, oc * uz * uy + s * ux, c + oc * uz * uz],
        axis=-1,
    ).reshape(B, Jn, 3, 3)
    R4 = jnp.tile(jnp.eye(4, dtype=jnp.float32), (B, Jn, 1, 1))
    R4 = R4.at[:, :, :3, :3].set(R)
    Jm = jnp.broadcast_to(jmat.astype(jnp.float32)[None], (B, Jn, 4, 4))
    results = [Jm[:, 0] @ R4[:, 0]]
    for i in range(1, Jn):
        local = Jm[:, i] @ R4[:, i]
        results.append(results[parents[i]] @ local)
    stacked = jnp.stack(results, axis=1)
    return stacked[:, :, :3, 3] + trans[:, None, :]


if __name__ == "__main__":
    B = 2        # batch
    Jn = 8       # number of joints
    # kintree: parent of joint i (parent[i] < i, parent[0] unused / root)
    parents = (-1, 0, 1, 2, 1, 4, 0, 6)

    key = jax.random.PRNGKey(0)
    k_pose, k_trans, k_off = jax.random.split(key, 3)

    pose = 0.5 * jax.random.normal(k_pose, (B, Jn, 3), dtype=jnp.float32)
    trans = jax.random.normal(k_trans, (B, 3), dtype=jnp.float32)

    # Deterministic synthetic rest-pose joint transforms: identity rotation,
    # random-but-fixed translation, homogeneous bottom row [0,0,0,1].
    offsets = 0.1 * jax.random.normal(k_off, (Jn, 3), dtype=jnp.float32)
    jmat = jnp.tile(jnp.eye(4, dtype=jnp.float32), (Jn, 1, 1))
    jmat = jmat.at[:, :3, 3].set(offsets)

    out = skeleton_forward(pose, trans, jmat, parents)
    out = jax.block_until_ready(out)

    ref = skeleton_reference(pose, trans, jmat, parents)
    assert out.shape == (B, Jn, 3)
    assert jnp.allclose(out, ref, atol=1e-4, rtol=1e-4), (
        f"max abs err {jnp.max(jnp.abs(out - ref))}"
    )
    print("KERNEL_OK")
</pallas_src>

<mosaic_0001>
module attributes {stable_mosaic.version = 11 : i64} {
  func.func @_skeleton_kernel(%arg0: i32, %arg1: memref<96xf32, #tpu.memory_space<smem>>, %arg2: memref<24x128xf32, #tpu.memory_space<vmem>>, %arg3: memref<3x128xf32, #tpu.memory_space<vmem>>, %arg4: memref<24x128xf32, #tpu.memory_space<vmem>>) attributes {dimension_semantics = [#tpu.dimension_semantics<parallel>], iteration_bounds = array<i64: 1>, scalar_prefetch = 0 : i64, scratch_operands = 0 : i64, tpu.core_type = #tpu.core_type<tc>, window_params = [{transform_indices = @transform_0, window_bounds = array<i64: 96>}, {transform_indices = @transform_1, window_bounds = array<i64: 24, 128>}, {transform_indices = @transform_2, window_bounds = array<i64: 3, 128>}, {transform_indices = @transform_3, window_bounds = array<i64: 24, 128>}]} {
    %c0 = arith.constant 0 : index
    %c0_0 = arith.constant 0 : index
    %0 = vector.load %arg2[%c0, %c0_0] : memref<24x128xf32, #tpu.memory_space<vmem>>, vector<8x128xf32>
    %c8 = arith.constant 8 : index
    %c0_1 = arith.constant 0 : index
    %1 = vector.load %arg2[%c8, %c0_1] : memref<24x128xf32, #tpu.memory_space<vmem>>, vector<8x128xf32>
    %c16 = arith.constant 16 : index
    %c0_2 = arith.constant 0 : index
    %2 = vector.load %arg2[%c16, %c0_2] : memref<24x128xf32, #tpu.memory_space<vmem>>, vector<8x128xf32>
    %3 = arith.mulf %0, %0 : vector<8x128xf32>
    %4 = arith.mulf %1, %1 : vector<8x128xf32>
    %5 = arith.addf %3, %4 : vector<8x128xf32>
    %6 = arith.mulf %2, %2 : vector<8x128xf32>
    %7 = arith.addf %5, %6 : vector<8x128xf32>
    %cst = arith.constant 1.000000e-16 : f32
    %8 = vector.broadcast %cst : f32 to vector<8x128xf32>
    %9 = arith.addf %7, %8 : vector<8x128xf32>
    %10 = math.rsqrt %9 : vector<8x128xf32>
    %11 = arith.mulf %9, %10 : vector<8x128xf32>
    %12 = arith.mulf %0, %10 : vector<8x128xf32>
    %13 = arith.mulf %1, %10 : vector<8x128xf32>
    %14 = arith.mulf %2, %10 : vector<8x128xf32>
    %15 = math.cos %11 : vector<8x128xf32>
    %16 = math.sin %11 : vector<8x128xf32>
    %cst_3 = arith.constant 1.000000e+00 : f32
    %17 = vector.broadcast %cst_3 : f32 to vector<8x128xf32>
    %18 = arith.subf %17, %15 : vector<8x128xf32>
    %19 = arith.mulf %18, %12 : vector<8x128xf32>
    %20 = arith.mulf %19, %12 : vector<8x128xf32>
    %21 = arith.addf %15, %20 : vector<8x128xf32>
    %22 = arith.mulf %18, %12 : vector<8x128xf32>
    %23 = arith.mulf %22, %13 : vector<8x128xf32>
    %24 = arith.mulf %16, %14 : vector<8x128xf32>
    %25 = arith.subf %23, %24 : vector<8x128xf32>
    %26 = arith.mulf %18, %12 : vector<8x128xf32>
    %27 = arith.mulf %26, %14 : vector<8x128xf32>
    %28 = arith.mulf %16, %13 : vector<8x128xf32>
    %29 = arith.addf %27, %28 : vector<8x128xf32>
    %30 = arith.mulf %18, %13 : vector<8x128xf32>
    %31 = arith.mulf %30, %12 : vector<8x128xf32>
    %32 = arith.mulf %16, %14 : vector<8x128xf32>
    %33 = arith.addf %31, %32 : vector<8x128xf32>
    %34 = arith.mulf %18, %13 : vector<8x128xf32>
    %35 = arith.mulf %34, %13 : vector<8x128xf32>
    %36 = arith.addf %15, %35 : vector<8x128xf32>
    %37 = arith.mulf %18, %13 : vector<8x128xf32>
    %38 = arith.mulf %37, %14 : vector<8x128xf32>
    %39 = arith.mulf %16, %12 : vector<8x128xf32>
    %40 = arith.subf %38, %39 : vector<8x128xf32>
    %41 = arith.mulf %18, %14 : vector<8x128xf32>
    %42 = arith.mulf %41, %12 : vector<8x128xf32>
    %43 = arith.mulf %16, %13 : vector<8x128xf32>
    %44 = arith.subf %42, %43 : vector<8x128xf32>
    %45 = arith.mulf %18, %14 : vector<8x128xf32>
    %46 = arith.mulf %45, %13 : vector<8x128xf32>
    %47 = arith.mulf %16, %12 : vector<8x128xf32>
    %48 = arith.addf %46, %47 : vector<8x128xf32>
    %49 = arith.mulf %18, %14 : vector<8x128xf32>
    %50 = arith.mulf %49, %14 : vector<8x128xf32>
    %51 = arith.addf %15, %50 : vector<8x128xf32>
    %c0_4 = arith.constant 0 : index
    %c0_5 = arith.constant 0 : index
    %52 = vector.load %arg3[%c0_4, %c0_5] : memref<3x128xf32, #tpu.memory_space<vmem>>, vector<1x128xf32>
    %c1 = arith.constant 1 : index
    %c0_6 = arith.constant 0 : index
    %53 = vector.load %arg3[%c1, %c0_6] : memref<3x128xf32, #tpu.memory_space<vmem>>, vector<1x128xf32>
    %c2 = arith.constant 2 : index
    %c0_7 = arith.constant 0 : index
    %54 = vector.load %arg3[%c2, %c0_7] : memref<3x128xf32, #tpu.memory_space<vmem>>, vector<1x128xf32>
    %c0_8 = arith.constant 0 : index
    %55 = memref.load %arg1[%c0_8] : memref<96xf32, #tpu.memory_space<smem>>
    %c1_9 = arith.constant 1 : index
    %56 = memref.load %arg1[%c1_9] : memref<96xf32, #tpu.memory_space<smem>>
    %c2_10 = arith.constant 2 : index
    %57 = memref.load %arg1[%c2_10] : memref<96xf32, #tpu.memory_space<smem>>
    %c4 = arith.constant 4 : index
    %58 = memref.load %arg1[%c4] : memref<96xf32, #tpu.memory_space<smem>>
    %c5 = arith.constant 5 : index
    %59 = memref.load %arg1[%c5] : memref<96xf32, #tpu.memory_space<smem>>
    %c6 = arith.constant 6 : index
    %60 = memref.load %arg1[%c6] : memref<96xf32, #tpu.memory_space<smem>>
    %c8_11 = arith.constant 8 : index
    %61 = memref.load %arg1[%c8_11] : memref<96xf32, #tpu.memory_space<smem>>
    %c9 = arith.constant 9 : index
    %62 = memref.load %arg1[%c9] : memref<96xf32, #tpu.memory_space<smem>>
    %c10 = arith.constant 10 : index
    %63 = memref.load %arg1[%c10] : memref<96xf32, #tpu.memory_space<smem>>
    %c3 = arith.constant 3 : index
    %64 = memref.load %arg1[%c3] : memref<96xf32, #tpu.memory_space<smem>>
    %c7 = arith.constant 7 : index
    %65 = memref.load %arg1[%c7] : memref<96xf32, #tpu.memory_space<smem>>
    %c11 = arith.constant 11 : index
    %66 = memref.load %arg1[%c11] : memref<96xf32, #tpu.memory_space<smem>>
    %67 = vector.extract_strided_slice %21 {offsets = [0, 0], sizes = [1, 128], strides = [1, 1]} : vector<8x128xf32> to vector<1x128xf32>
    %68 = vector.extract_strided_slice %25 {offsets = [0, 0], sizes = [1, 128], strides = [1, 1]} : vector<8x128xf32> to vector<1x128xf32>
    %69 = vector.extract_strided_slice %29 {offsets = [0, 0], sizes = [1, 128], strides = [1, 1]} : vector<8x128xf32> to vector<1x128xf32>
    %70 = vector.extract_strided_slice %33 {offsets = [0, 0], sizes = [1, 128], strides = [1, 1]} : vector<8x128xf32> to vector<1x128xf32>
    %71 = vector.extract_strided_slice %36 {offsets = [0, 0], sizes = [1, 128], strides = [1, 1]} : vector<8x128xf32> to vector<1x128xf32>
    %72 = vector.extract_strided_slice %40 {offsets = [0, 0], sizes = [1, 128], strides = [1, 1]} : vector<8x128xf32> to vector<1x128xf32>
    %73 = vector.extract_strided_slice %44 {offsets = [0, 0], sizes = [1, 128], strides = [1, 1]} : vector<8x128xf32> to vector<1x128xf32>
    %74 = vector.extract_strided_slice %48 {offsets = [0, 0], sizes = [1, 128], strides = [1, 1]} : vector<8x128xf32> to vector<1x128xf32>
    %75 = vector.extract_strided_slice %51 {offsets = [0, 0], sizes = [1, 128], strides = [1, 1]} : vector<8x128xf32> to vector<1x128xf32>
    %76 = vector.broadcast %55 : f32 to vector<1x128xf32>
    %77 = arith.mulf %76, %67 : vector<1x128xf32>
    %78 = vector.broadcast %56 : f32 to vector<1x128xf32>
    %79 = arith.mulf %78, %70 : vector<1x128xf32>
    %80 = arith.addf %77, %79 : vector<1x128xf32>
    %81 = vector.broadcast %57 : f32 to vector<1x128xf32>
    %82 = arith.mulf %81, %73 : vector<1x128xf32>
    %83 = arith.addf %80, %82 : vector<1x128xf32>
    %84 = vector.broadcast %55 : f32 to vector<1x128xf32>
    %85 = arith.mulf %84, %68 : vector<1x128xf32>
    %86 = vector.broadcast %56 : f32 to vector<1x128xf32>
    %87 = arith.mulf %86, %71 : vector<1x128xf32>
    %88 = arith.addf %85, %87 : vector<1x128xf32>
    %89 = vector.broadcast %57 : f32 to vector<1x128xf32>
    %90 = arith.mulf %89, %74 : vector<1x128xf32>
    %91 = arith.addf %88, %90 : vector<1x128xf32>
    %92 = vector.broadcast %55 : f32 to vector<1x128xf32>
    %93 = arith.mulf %92, %69 : vector<1x128xf32>
    %94 = vector.broadcast %56 : f32 to vector<1x128xf32>
    %95 = arith.mulf %94, %72 : vector<1x128xf32>
    %96 = arith.addf %93, %95 : vector<1x128xf32>
    %97 = vector.broadcast %57 : f32 to vector<1x128xf32>
    %98 = arith.mulf %97, %75 : vector<1x128xf32>
    %99 = arith.addf %96, %98 : vector<1x128xf32>
    %100 = vector.broadcast %58 : f32 to vector<1x128xf32>
    %101 = arith.mulf %100, %67 : vector<1x128xf32>
    %102 = vector.broadcast %59 : f32 to vector<1x128xf32>
    %103 = arith.mulf %102, %70 : vector<1x128xf32>
    %104 = arith.addf %101, %103 : vector<1x128xf32>
    %105 = vector.broadcast %60 : f32 to vector<1x128xf32>
    %106 = arith.mulf %105, %73 : vector<1x128xf32>
    %107 = arith.addf %104, %106 : vector<1x128xf32>
    %108 = vector.broadcast %58 : f32 to vector<1x128xf32>
    %109 = arith.mulf %108, %68 : vector<1x128xf32>
    %110 = vector.broadcast %59 : f32 to vector<1x128xf32>
    %111 = arith.mulf %110, %71 : vector<1x128xf32>
    %112 = arith.addf %109, %111 : vector<1x128xf32>
    %113 = vector.broadcast %60 : f32 to vector<1x128xf32>
    %114 = arith.mulf %113, %74 : vector<1x128xf32>
    %115 = arith.addf %112, %114 : vector<1x128xf32>
    %116 = vector.broadcast %58 : f32 to vector<1x128xf32>
    %117 = arith.mulf %116, %69 : vector<1x128xf32>
    %118 = vector.broadcast %59 : f32 to vector<1x128xf32>
    %119 = arith.mulf %118, %72 : vector<1x128xf32>
    %120 = arith.addf %117, %119 : vector<1x128xf32>
    %121 = vector.broadcast %60 : f32 to vector<1x128xf32>
    %122 = arith.mulf %121, %75 : vector<1x128xf32>
    %123 = arith.addf %120, %122 : vector<1x128xf32>
    %124 = vector.broadcast %61 : f32 to vector<1x128xf32>
    %125 = arith.mulf %124, %67 : vector<1x128xf32>
    %126 = vector.broadcast %62 : f32 to vector<1x128xf32>
    %127 = arith.mulf %126, %70 : vector<1x128xf32>
    %128 = arith.addf %125, %127 : vector<1x128xf32>
    %129 = vector.broadcast %63 : f32 to vector<1x128xf32>
    %130 = arith.mulf %129, %73 : vector<1x128xf32>
    %131 = arith.addf %128, %130 : vector<1x128xf32>
    %132 = vector.broadcast %61 : f32 to vector<1x128xf32>
    %133 = arith.mulf %132, %68 : vector<1x128xf32>
    %134 = vector.broadcast %62 : f32 to vector<1x128xf32>
    %135 = arith.mulf %134, %71 : vector<1x128xf32>
    %136 = arith.addf %133, %135 : vector<1x128xf32>
    %137 = vector.broadcast %63 : f32 to vector<1x128xf32>
    %138 = arith.mulf %137, %74 : vector<1x128xf32>
    %139 = arith.addf %136, %138 : vector<1x128xf32>
    %140 = vector.broadcast %61 : f32 to vector<1x128xf32>
    %141 = arith.mulf %140, %69 : vector<1x128xf32>
    %142 = vector.broadcast %62 : f32 to vector<1x128xf32>
    %143 = arith.mulf %142, %72 : vector<1x128xf32>
    %144 = arith.addf %141, %143 : vector<1x128xf32>
    %145 = vector.broadcast %63 : f32 to vector<1x128xf32>
    %146 = arith.mulf %145, %75 : vector<1x128xf32>
    %147 = arith.addf %144, %146 : vector<1x128xf32>
    %148 = vector.broadcast %64 : f32 to vector<1x128xf32>
    %149 = arith.addf %148, %52 : vector<1x128xf32>
    %c0_12 = arith.constant 0 : index
    %c0_13 = arith.constant 0 : index
    %150 = vector.load %arg4[%c0_12, %c0_13] : memref<24x128xf32, #tpu.memory_space<vmem>>, vector<1x128xf32>
    tpu.vector_store %arg4[%c0_12, %c0_13], %149 {strides = array<i32>} : memref<24x128xf32, #tpu.memory_space<vmem>>, vector<1x128xf32>,
    %151 = vector.broadcast %65 : f32 to vector<1x128xf32>
    %152 = arith.addf %151, %53 : vector<1x128xf32>
    %c8_14 = arith.constant 8 : index
    %c0_15 = arith.constant 0 : index
    %153 = vector.load %arg4[%c8_14, %c0_15] : memref<24x128xf32, #tpu.memory_space<vmem>>, vector<1x128xf32>
    tpu.vector_store %arg4[%c8_14, %c0_15], %152 {strides = array<i32>} : memref<24x128xf32, #tpu.memory_space<vmem>>, vector<1x128xf32>,
    %154 = vector.broadcast %66 : f32 to vector<1x128xf32>
    %155 = arith.addf %154, %54 : vector<1x128xf32>
    %c16_16 = arith.constant 16 : index
    %c0_17 = arith.constant 0 : index
    %156 = vector.load %arg4[%c16_16, %c0_17] : memref<24x128xf32, #tpu.memory_space<vmem>>, vector<1x128xf32>
    tpu.vector_store %arg4[%c16_16, %c0_17], %155 {strides = array<i32>} : memref<24x128xf32, #tpu.memory_space<vmem>>, vector<1x128xf32>,
    %c12 = arith.constant 12 : index
    %157 = memref.load %arg1[%c12] : memref<96xf32, #tpu.memory_space<smem>>
    %c13 = arith.constant 13 : index
    %158 = memref.load %arg1[%c13] : memref<96xf32, #tpu.memory_space<smem>>
    %c14 = arith.constant 14 : index
    %159 = memref.load %arg1[%c14] : memref<96xf32, #tpu.memory_space<smem>>
    %c16_18 = arith.constant 16 : index
    %160 = memref.load %arg1[%c16_18] : memref<96xf32, #tpu.memory_space<smem>>
    %c17 = arith.constant 17 : index
    %161 = memref.load %arg1[%c17] : memref<96xf32, #tpu.memory_space<smem>>
    %c18 = arith.constant 18 : index
    %162 = memref.load %arg1[%c18] : memref<96xf32, #tpu.memory_space<smem>>
    %c20 = arith.constant 20 : index
    %163 = memref.load %arg1[%c20] : memref<96xf32, #tpu.memory_space<smem>>
    %c21 = arith.constant 21 : index
    %164 = memref.load %arg1[%c21] : memref<96xf32, #tpu.memory_space<smem>>
    %c22 = arith.constant 22 : index
    %165 = memref.load %arg1[%c22] : memref<96xf32, #tpu.memory_space<smem>>
    %c15 = arith.constant 15 : index
    %166 = memref.load %arg1[%c15] : memref<96xf32, #tpu.memory_space<smem>>
    %c19 = arith.constant 19 : index
    %167 = memref.load %arg1[%c19] : memref<96xf32, #tpu.memory_space<smem>>
    %c23 = arith.constant 23 : index
    %168 = memref.load %arg1[%c23] : memref<96xf32, #tpu.memory_space<smem>>
    %169 = vector.broadcast %166 : f32 to vector<1x128xf32>
    %170 = arith.mulf %83, %169 : vector<1x128xf32>
    %171 = vector.broadcast %167 : f32 to vector<1x128xf32>
    %172 = arith.mulf %91, %171 : vector<1x128xf32>
    %173 = arith.addf %170, %172 : vector<1x128xf32>
    %174 = vector.broadcast %168 : f32 to vector<1x128xf32>
    %175 = arith.mulf %99, %174 : vector<1x128xf32>
    %176 = arith.addf %173, %175 : vector<1x128xf32>
    %177 = vector.broadcast %64 : f32 to vector<1x128xf32>
    %178 = arith.addf %176, %177 : vector<1x128xf32>
    %179 = vector.broadcast %166 : f32 to vector<1x128xf32>
    %180 = arith.mulf %107, %179 : vector<1x128xf32>
    %181 = vector.broadcast %167 : f32 to vector<1x128xf32>
    %182 = arith.mulf %115, %181 : vector<1x128xf32>
    %183 = arith.addf %180, %182 : vector<1x128xf32>
    %184 = vector.broadcast %168 : f32 to vector<1x128xf32>
    %185 = arith.mulf %123, %184 : vector<1x128xf32>
    %186 = arith.addf %183, %185 : vector<1x128xf32>
    %187 = vector.broadcast %65 : f32 to vector<1x128xf32>
    %188 = arith.addf %186, %187 : vector<1x128xf32>
    %189 = vector.broadcast %166 : f32 to vector<1x128xf32>
    %190 = arith.mulf %131, %189 : vector<1x128xf32>
    %191 = vector.broadcast %167 : f32 to vector<1x128xf32>
    %192 = arith.mulf %139, %191 : vector<1x128xf32>
    %193 = arith.addf %190, %192 : vector<1x128xf32>
    %194 = vector.broadcast %168 : f32 to vector<1x128xf32>
    %195 = arith.mulf %147, %194 : vector<1x128xf32>
    %196 = arith.addf %193, %195 : vector<1x128xf32>
    %197 = vector.broadcast %66 : f32 to vector<1x128xf32>
    %198 = arith.addf %196, %197 : vector<1x128xf32>
    %199 = vector.extract_strided_slice %21 {offsets = [1, 0], sizes = [1, 128], strides = [1, 1]} : vector<8x128xf32> to vector<1x128xf32>
    %200 = vector.extract_strided_slice %25 {offsets = [1, 0], sizes = [1, 128], strides = [1, 1]} : vector<8x128xf32> to vector<1x128xf32>
    %201 = vector.extract_strided_slice %29 {offsets = [1, 0], sizes = [1, 128], strides = [1, 1]} : vector<8x128xf32> to vector<1x128xf32>
    %202 = vector.extract_strided_slice %33 {offsets = [1, 0], sizes = [1, 128], strides = [1, 1]} : vector<8x128xf32> to vector<1x128xf32>
    %203 = vector.extract_strided_slice %36 {offsets = [1, 0], sizes = [1, 128], strides = [1, 1]} : vector<8x128xf32> to vector<1x128xf32>
    %204 = vector.extract_strided_slice %40 {offsets = [1, 0], sizes = [1, 128], strides = [1, 1]} : vector<8x128xf32> to vector<1x128xf32>
    %205 = vector.extract_strided_slice %44 {offsets = [1, 0], sizes = [1, 128], strides = [1, 1]} : vector<8x128xf32> to vector<1x128xf32>
    %206 = vector.extract_strided_slice %48 {offsets = [1, 0], sizes = [1, 128], strides = [1, 1]} : vector<8x128xf32> to vector<1x128xf32>
    %207 = vector.extract_strided_slice %51 {offsets = [1, 0], sizes = [1, 128], strides = [1, 1]} : vector<8x128xf32> to vector<1x128xf32>
    %208 = vector.broadcast %157 : f32 to vector<1x128xf32>
    %209 = arith.mulf %208, %199 : vector<1x128xf32>
    %210 = vector.broadcast %158 : f32 to vector<1x128xf32>
    %211 = arith.mulf %210, %202 : vector<1x128xf32>
    %212 = arith.addf %209, %211 : vector<1x128xf32>
    %213 = vector.broadcast %159 : f32 to vector<1x128xf32>
    %214 = arith.mulf %213, %205 : vector<1x128xf32>
    %215 = arith.addf %212, %214 : vector<1x128xf32>
    %216 = vector.broadcast %157 : f32 to vector<1x128xf32>
    %217 = arith.mulf %216, %200 : vector<1x128xf32>
    %218 = vector.broadcast %158 : f32 to vector<1x128xf32>
    %219 = arith.mulf %218, %203 : vector<1x128xf32>
    %220 = arith.addf %217, %219 : vector<1x128xf32>
    %221 = vector.broadcast %159 : f32 to vector<1x128xf32>
    %222 = arith.mulf %221, %206 : vector<1x128xf32>
    %223 = arith.addf %220, %222 : vector<1x128xf32>
    %224 = vector.broadcast %157 : f32 to vector<1x128xf32>
    %225 = arith.mulf %224, %201 : vector<1x128xf32>
    %226 = vector.broadcast %158 : f32 to vector<1x128xf32>
    %227 = arith.mulf %226, %204 : vector<1x128xf32>
    %228 = arith.addf %225, %227 : vector<1x128xf32>
    %229 = vector.broadcast %159 : f32 to vector<1x128xf32>
    %230 = arith.mulf %229, %207 : vector<1x128xf32>
    %231 = arith.addf %228, %230 : vector<1x128xf32>
    %232 = vector.broadcast %160 : f32 to vector<1x128xf32>
    %233 = arith.mulf %232, %199 : vector<1x128xf32>
    %234 = vector.broadcast %161 : f32 to vector<1x128xf32>
    %235 = arith.mulf %234, %202 : vector<1x128xf32>
    %236 = arith.addf %233, %235 : vector<1x128xf32>
    %237 = vector.broadcast %162 : f32 to vector<1x128xf32>
    %238 = arith.mulf %237, %205 : vector<1x128xf32>
    %239 = arith.addf %236, %238 : vector<1x128xf32>
    %240 = vector.broadcast %160 : f32 to vector<1x128xf32>
    %241 = arith.mulf %240, %200 : vector<1x128xf32>
    %242 = vector.broadcast %161 : f32 to vector<1x128xf32>
    %243 = arith.mulf %242, %203 : vector<1x128xf32>
    %244 = arith.addf %241, %243 : vector<1x128xf32>
    %245 = vector.broadcast %162 : f32 to vector<1x128xf32>
    %246 = arith.mulf %245, %206 : vector<1x128xf32>
    %247 = arith.addf %244, %246 : vector<1x128xf32>
    %248 = vector.broadcast %160 : f32 to vector<1x128xf32>
    %249 = arith.mulf %248, %201 : vector<1x128xf32>
    %250 = vector.broadcast %161 : f32 to vector<1x128xf32>
    %251 = arith.mulf %250, %204 : vector<1x128xf32>
    %252 = arith.addf %249, %251 : vector<1x128xf32>
    %253 = vector.broadcast %162 : f32 to vector<1x128xf32>
    %254 = arith.mulf %253, %207 : vector<1x128xf32>
    %255 = arith.addf %252, %254 : vector<1x128xf32>
    %256 = vector.broadcast %163 : f32 to vector<1x128xf32>
    %257 = arith.mulf %256, %199 : vector<1x128xf32>
    %258 = vector.broadcast %164 : f32 to vector<1x128xf32>
    %259 = arith.mulf %258, %202 : vector<1x128xf32>
    %260 = arith.addf %257, %259 : vector<1x128xf32>
    %261 = vector.broadcast %165 : f32 to vector<1x128xf32>
    %262 = arith.mulf %261, %205 : vector<1x128xf32>
    %263 = arith.addf %260, %262 : vector<1x128xf32>
    %264 = vector.broadcast %163 : f32 to vector<1x128xf32>
    %265 = arith.mulf %264, %200 : vector<1x128xf32>
    %266 = vector.broadcast %164 : f32 to vector<1x128xf32>
    %267 = arith.mulf %266, %203 : vector<1x128xf32>
    %268 = arith.addf %265, %267 : vector<1x128xf32>
    %269 = vector.broadcast %165 : f32 to vector<1x128xf32>
    %270 = arith.mulf %269, %206 : vector<1x128xf32>
    %271 = arith.addf %268, %270 : vector<1x128xf32>
    %272 = vector.broadcast %163 : f32 to vector<1x128xf32>
    %273 = arith.mulf %272, %201 : vector<1x128xf32>
    %274 = vector.broadcast %164 : f32 to vector<1x128xf32>
    %275 = arith.mulf %274, %204 : vector<1x128xf32>
    %276 = arith.addf %273, %275 : vector<1x128xf32>
    %277 = vector.broadcast %165 : f32 to vector<1x128xf32>
    %278 = arith.mulf %277, %207 : vector<1x128xf32>
    %279 = arith.addf %276, %278 : vector<1x128xf32>
    %280 = arith.mulf %83, %215 : vector<1x128xf32>
    %281 = arith.mulf %91, %239 : vector<1x128xf32>
    %282 = arith.addf %280, %281 : vector<1x128xf32>
    %283 = arith.mulf %99, %263 : vector<1x128xf32>
    %284 = arith.addf %282, %283 : vector<1x128xf32>
    %285 = arith.mulf %83, %223 : vector<1x128xf32>
    %286 = arith.mulf %91, %247 : vector<1x128xf32>
    %287 = arith.addf %285, %286 : vector<1x128xf32>
    %288 = arith.mulf %99, %271 : vector<1x128xf32>
    %289 = arith.addf %287, %288 : vector<1x128xf32>
    %290 = arith.mulf %83, %231 : vector<1x128xf32>
    %291 = arith.mulf %91, %255 : vector<1x128xf32>
    %292 = arith.addf %290, %291 : vector<1x128xf32>
    %293 = arith.mulf %99, %279 : vector<1x128xf32>
    %294 = arith.addf %292, %293 : vector<1x128xf32>
    %295 = arith.mulf %107, %215 : vector<1x128xf32>
    %296 = arith.mulf %115, %239 : vector<1x128xf32>
    %297 = arith.addf %295, %296 : vector<1x128xf32>
    %298 = arith.mulf %123, %263 : vector<1x128xf32>
    %299 = arith.addf %297, %298 : vector<1x128xf32>
    %300 = arith.mulf %107, %223 : vector<1x128xf32>
    %301 = arith.mulf %115, %247 : vector<1x128xf32>
    %302 = arith.addf %300, %301 : vector<1x128xf32>
    %303 = arith.mulf %123, %271 : vector<1x128xf32>
    %304 = arith.addf %302, %303 : vector<1x128xf32>
    %305 = arith.mulf %107, %231 : vector<1x128xf32>
    %306 = arith.mulf %115, %255 : vector<1x128xf32>
    %307 = arith.addf %305, %306 : vector<1x128xf32>
    %308 = arith.mulf %123, %279 : vector<1x128xf32>
    %309 = arith.addf %307, %308 : vector<1x128xf32>
    %310 = arith.mulf %131, %215 : vector<1x128xf32>
    %311 = arith.mulf %139, %239 : vector<1x128xf32>
    %312 = arith.addf %310, %311 : vector<1x128xf32>
    %313 = arith.mulf %147, %263 : vector<1x128xf32>
    %314 = arith.addf %312, %313 : vector<1x128xf32>
    %315 = arith.mulf %131, %223 : vector<1x128xf32>
    %316 = arith.mulf %139, %247 : vector<1x128xf32>
    %317 = arith.addf %315, %316 : vector<1x128xf32>
    %318 = arith.mulf %147, %271 : vector<1x128xf32>
    %319 = arith.addf %317, %318 : vector<1x128xf32>
    %320 = arith.mulf %131, %231 : vector<1x128xf32>
    %321 = arith.mulf %139, %255 : vector<1x128xf32>
    %322 = arith.addf %320, %321 : vector<1x128xf32>
    %323 = arith.mulf %147, %279 : vector<1x128xf32>
    %324 = arith.addf %322, %323 : vector<1x128xf32>
    %325 = arith.addf %178, %52 : vector<1x128xf32>
    %c1_19 = arith.constant 1 : index
    %c0_20 = arith.constant 0 : index
    %326 = vector.load %arg4[%c1_19, %c0_20] : memref<24x128xf32, #tpu.memory_space<vmem>>, vector<1x128xf32>
    tpu.vector_store %arg4[%c1_19, %c0_20], %325 {strides = array<i32>} : memref<24x128xf32, #tpu.memory_space<vmem>>, vector<1x128xf32>,
    %327 = arith.addf %188, %53 : vector<1x128xf32>
    %c9_21 = arith.constant 9 : index
    %c0_22 = arith.constant 0 : index
    %328 = vector.load %arg4[%c9_21, %c0_22] : memref<24x128xf32, #tpu.memory_space<vmem>>, vector<1x128xf32>
    tpu.vector_store %arg4[%c9_21, %c0_22], %327 {strides = array<i32>} : memref<24x128xf32, #tpu.memory_space<vmem>>, vector<1x128xf32>,
    %329 = arith.addf %198, %54 : vector<1x128xf32>
    %c17_23 = arith.constant 17 : index
    %c0_24 = arith.constant 0 : index
    %330 = vector.load %arg4[%c17_23, %c0_24] : memref<24x128xf32, #tpu.memory_space<vmem>>, vector<1x128xf32>
    tpu.vector_store %arg4[%c17_23, %c0_24], %329 {strides = array<i32>} : memref<24x128xf32, #tpu.memory_space<vmem>>, vector<1x128xf32>,
    %c24 = arith.constant 24 : index
    %331 = memref.load %arg1[%c24] : memref<96xf32, #tpu.memory_space<smem>>
    %c25 = arith.constant 25 : index
    %332 = memref.load %arg1[%c25] : memref<96xf32, #tpu.memory_space<smem>>
    %c26 = arith.constant 26 : index
    %333 = memref.load %arg1[%c26] : memref<96xf32, #tpu.memory_space<smem>>
    %c28 = arith.constant 28 : index
    %334 = memref.load %arg1[%c28] : memref<96xf32, #tpu.memory_space<smem>>
    %c29 = arith.constant 29 : index
    %335 = memref.load %arg1[%c29] : memref<96xf32, #tpu.memory_space<smem>>
    %c30 = arith.constant 30 : index
    %336 = memref.load %arg1[%c30] : memref<96xf32, #tpu.memory_space<smem>>
    %c32 = arith.constant 32 : index
    %337 = memref.load %arg1[%c32] : memref<96xf32, #tpu.memory_space<smem>>
    %c33 = arith.constant 33 : index
    %338 = memref.load %arg1[%c33] : memref<96xf32, #tpu.memory_space<smem>>
    %c34 = arith.constant 34 : index
    %339 = memref.load %arg1[%c34] : memref<96xf32, #tpu.memory_space<smem>>
    %c27 = arith.constant 27 : index
    %340 = memref.load %arg1[%c27] : memref<96xf32, #tpu.memory_space<smem>>
    %c31 = arith.constant 31 : index
    %341 = memref.load %arg1[%c31] : memref<96xf32, #tpu.memory_space<smem>>
    %c35 = arith.constant 35 : index
    %342 = memref.load %arg1[%c35] : memref<96xf32, #tpu.memory_space<smem>>
    %343 = vector.broadcast %340 : f32 to vector<1x128xf32>
    %344 = arith.mulf %284, %343 : vector<1x128xf32>
    %345 = vector.broadcast %341 : f32 to vector<1x128xf32>
    %346 = arith.mulf %289, %345 : vector<1x128xf32>
    %347 = arith.addf %344, %346 : vector<1x128xf32>
    %348 = vector.broadcast %342 : f32 to vector<1x128xf32>
    %349 = arith.mulf %294, %348 : vector<1x128xf32>
    %350 = arith.addf %347, %349 : vector<1x128xf32>
    %351 = arith.addf %350, %178 : vector<1x128xf32>
    %352 = vector.broadcast %340 : f32 to vector<1x128xf32>
    %353 = arith.mulf %299, %352 : vector<1x128xf32>
    %354 = vector.broadcast %341 : f32 to vector<1x128xf32>
    %355 = arith.mulf %304, %354 : vector<1x128xf32>
    %356 = arith.addf %353, %355 : vector<1x128xf32>
    %357 = vector.broadcast %342 : f32 to vector<1x128xf32>
    %358 = arith.mulf %309, %357 : vector<1x128xf32>
    %359 = arith.addf %356, %358 : vector<1x128xf32>
    %360 = arith.addf %359, %188 : vector<1x128xf32>
    %361 = vector.broadcast %340 : f32 to vector<1x128xf32>
    %362 = arith.mulf %314, %361 : vector<1x128xf32>
    %363 = vector.broadcast %341 : f32 to vector<1x128xf32>
    %364 = arith.mulf %319, %363 : vector<1x128xf32>
    %365 = arith.addf %362, %364 : vector<1x128xf32>
    %366 = vector.broadcast %342 : f32 to vector<1x128xf32>
    %367 = arith.mulf %324, %366 : vector<1x128xf32>
    %368 = arith.addf %365, %367 : vector<1x128xf32>
    %369 = arith.addf %368, %198 : vector<1x128xf32>
    %370 = vector.extract_strided_slice %21 {offsets = [2, 0], sizes = [1, 128], strides = [1, 1]} : vector<8x128xf32> to vector<1x128xf32>
    %371 = vector.extract_strided_slice %25 {offsets = [2, 0], sizes = [1, 128], strides = [1, 1]} : vector<8x128xf32> to vector<1x128xf32>
    %372 = vector.extract_strided_slice %29 {offsets = [2, 0], sizes = [1, 128], strides = [1, 1]} : vector<8x128xf32> to vector<1x128xf32>
    %373 = vector.extract_strided_slice %33 {offsets = [2, 0], sizes = [1, 128], strides = [1, 1]} : vector<8x128xf32> to vector<1x128xf32>
    %374 = vector.extract_strided_slice %36 {offsets = [2, 0], sizes = [1, 128], strides = [1, 1]} : vector<8x128xf32> to vector<1x128xf32>
    %375 = vector.extract_strided_slice %40 {offsets = [2, 0], sizes = [1, 128], strides = [1, 1]} : vector<8x128xf32> to vector<1x128xf32>
    %376 = vector.extract_strided_slice %44 {offsets = [2, 0], sizes = [1, 128], strides = [1, 1]} : vector<8x128xf32> to vector<1x128xf32>
    %377 = vector.extract_strided_slice %48 {offsets = [2, 0], sizes = [1, 128], strides = [1, 1]} : vector<8x128xf32> to vector<1x128xf32>
    %378 = vector.extract_strided_slice %51 {offsets = [2, 0], sizes = [1, 128], strides = [1, 1]} : vector<8x128xf32> to vector<1x128xf32>
    %379 = vector.broadcast %331 : f32 to vector<1x128xf32>
    %380 = arith.mulf %379, %370 : vector<1x128xf32>
    %381 = vector.broadcast %332 : f32 to vector<1x128xf32>
    %382 = arith.mulf %381, %373 : vector<1x128xf32>
    %383 = arith.addf %380, %382 : vector<1x128xf32>
    %384 = vector.broadcast %333 : f32 to vector<1x128xf32>
    %385 = arith.mulf %384, %376 : vector<1x128xf32>
    %386 = arith.addf %383, %385 : vector<1x128xf32>
    %387 = vector.broadcast %331 : f32 to vector<1x128xf32>
    %388 = arith.mulf %387, %371 : vector<1x128xf32>
    %389 = vector.broadcast %332 : f32 to vector<1x128xf32>
    %390 = arith.mulf %389, %374 : vector<1x128xf32>
    %391 = arith.addf %388, %390 : vector<1x128xf32>
    %392 = vector.broadcast %333 : f32 to vector<1x128xf32>
    %393 = arith.mulf %392, %377 : vector<1x128xf32>
    %394 = arith.addf %391, %393 : vector<1x128xf32>
    %395 = vector.broadcast %331 : f32 to vector<1x128xf32>
    %396 = arith.mulf %395, %372 : vector<1x128xf32>
    %397 = vector.broadcast %332 : f32 to vector<1x128xf32>
    %398 = arith.mulf %397, %375 : vector<1x128xf32>
    %399 = arith.addf %396, %398 : vector<1x128xf32>
    %400 = vector.broadcast %333 : f32 to vector<1x128xf32>
    %401 = arith.mulf %400, %378 : vector<1x128xf32>
    %402 = arith.addf %399, %401 : vector<1x128xf32>
    %403 = vector.broadcast %334 : f32 to vector<1x128xf32>
    %404 = arith.mulf %403, %370 : vector<1x128xf32>
    %405 = vector.broadcast %335 : f32 to vector<1x128xf32>
    %406 = arith.mulf %405, %373 : vector<1x128xf32>
    %407 = arith.addf %404, %406 : vector<1x128xf32>
    %408 = vector.broadcast %336 : f32 to vector<1x128xf32>
    %409 = arith.mulf %408, %376 : vector<1x128xf32>
    %410 = arith.addf %407, %409 : vector<1x128xf32>
    %411 = vector.broadcast %334 : f32 to vector<1x128xf32>
    %412 = arith.mulf %411, %371 : vector<1x128xf32>
    %413 = vector.broadcast %335 : f32 to vector<1x128xf32>
    %414 = arith.mulf %413, %374 : vector<1x128xf32>
    %415 = arith.addf %412, %414 : vector<1x128xf32>
    %416 = vector.broadcast %336 : f32 to vector<1x128xf32>
    %417 = arith.mulf %416, %377 : vector<1x128xf32>
    %418 = arith.addf %415, %417 : vector<1x128xf32>
    %419 = vector.broadcast %334 : f32 to vector<1x128xf32>
    %420 = arith.mulf %419, %372 : vector<1x128xf32>
    %421 = vector.broadcast %335 : f32 to vector<1x128xf32>
    %422 = arith.mulf %421, %375 : vector<1x128xf32>
    %423 = arith.addf %420, %422 : vector<1x128xf32>
    %424 = vector.broadcast %336 : f32 to vector<1x128xf32>
    %425 = arith.mulf %424, %378 : vector<1x128xf32>
    %426 = arith.addf %423, %425 : vector<1x128xf32>
    %427 = vector.broadcast %337 : f32 to vector<1x128xf32>
    %428 = arith.mulf %427, %370 : vector<1x128xf32>
    %429 = vector.broadcast %338 : f32 to vector<1x128xf32>
    %430 = arith.mulf %429, %373 : vector<1x128xf32>
    %431 = arith.addf %428, %430 : vector<1x128xf32>
    %432 = vector.broadcast %339 : f32 to vector<1x128xf32>
    %433 = arith.mulf %432, %376 : vector<1x128xf32>
    %434 = arith.addf %431, %433 : vector<1x128xf32>
    %435 = vector.broadcast %337 : f32 to vector<1x128xf32>
    %436 = arith.mulf %435, %371 : vector<1x128xf32>
    %437 = vector.broadcast %338 : f32 to vector<1x128xf32>
    %438 = arith.mulf %437, %374 : vector<1x128xf32>
    %439 = arith.addf %436, %438 : vector<1x128xf32>
    %440 = vector.broadcast %339 : f32 to vector<1x128xf32>
    %441 = arith.mulf %440, %377 : vector<1x128xf32>
    %442 = arith.addf %439, %441 : vector<1x128xf32>
    %443 = vector.broadcast %337 : f32 to vector<1x128xf32>
    %444 = arith.mulf %443, %372 : vector<1x128xf32>
    %445 = vector.broadcast %338 : f32 to vector<1x128xf32>
    %446 = arith.mulf %445, %375 : vector<1x128xf32>
    %447 = arith.addf %444, %446 : vector<1x128xf32>
    %448 = vector.broadcast %339 : f32 to vector<1x128xf32>
    %449 = arith.mulf %448, %378 : vector<1x128xf32>
    %450 = arith.addf %447, %449 : vector<1x128xf32>
    %451 = arith.mulf %284, %386 : vector<1x128xf32>
    %452 = arith.mulf %289, %410 : vector<1x128xf32>
    %453 = arith.addf %451, %452 : vector<1x128xf32>
    %454 = arith.mulf %294, %434 : vector<1x128xf32>
    %455 = arith.addf %453, %454 : vector<1x128xf32>
    %456 = arith.mulf %284, %394 : vector<1x128xf32>
    %457 = arith.mulf %289, %418 : vector<1x128xf32>
    %458 = arith.addf %456, %457 : vector<1x128xf32>
    %459 = arith.mulf %294, %442 : vector<1x128xf32>
    %460 = arith.addf %458, %459 : vector<1x128xf32>
    %461 = arith.mulf %284, %402 : vector<1x128xf32>
    %462 = arith.mulf %289, %426 : vector<1x128xf32>
    %463 = arith.addf %461, %462 : vector<1x128xf32>
    %464 = arith.mulf %294, %450 : vector<1x128xf32>
    %465 = arith.addf %463, %464 : vector<1x128xf32>
    %466 = arith.mulf %299, %386 : vector<1x128xf32>
    %467 = arith.mulf %304, %410 : vector<1x128xf32>
    %468 = arith.addf %466, %467 : vector<1x128xf32>
    %469 = arith.mulf %309, %434 : vector<1x128xf32>
    %470 = arith.addf %468, %469 : vector<1x128xf32>
    %471 = arith.mulf %299, %394 : vector<1x128xf32>
    %472 = arith.mulf %304, %418 : vector<1x128xf32>
    %473 = arith.addf %471, %472 : vector<1x128xf32>
    %474 = arith.mulf %309, %442 : vector<1x128xf32>
    %475 = arith.addf %473, %474 : vector<1x128xf32>
    %476 = arith.mulf %299, %402 : vector<1x128xf32>
    %477 = arith.mulf %304, %426 : vector<1x128xf32>
    %478 = arith.addf %476, %477 : vector<1x128xf32>
    %479 = arith.mulf %309, %450 : vector<1x128xf32>
    %480 = arith.addf %478, %479 : vector<1x128xf32>
    %481 = arith.mulf %314, %386 : vector<1x128xf32>
    %482 = arith.mulf %319, %410 : vector<1x128xf32>
    %483 = arith.addf %481, %482 : vector<1x128xf32>
    %484 = arith.mulf %324, %434 : vector<1x128xf32>
    %485 = arith.addf %483, %484 : vector<1x128xf32>
    %486 = arith.mulf %314, %394 : vector<1x128xf32>
    %487 = arith.mulf %319, %418 : vector<1x128xf32>
    %488 = arith.addf %486, %487 : vector<1x128xf32>
    %489 = arith.mulf %324, %442 : vector<1x128xf32>
    %490 = arith.addf %488, %489 : vector<1x128xf32>
    %491 = arith.mulf %314, %402 : vector<1x128xf32>
    %492 = arith.mulf %319, %426 : vector<1x128xf32>
    %493 = arith.addf %491, %492 : vector<1x128xf32>
    %494 = arith.mulf %324, %450 : vector<1x128xf32>
    %495 = arith.addf %493, %494 : vector<1x128xf32>
    %496 = arith.addf %351, %52 : vector<1x128xf32>
    %c2_25 = arith.constant 2 : index
    %c0_26 = arith.constant 0 : index
    %497 = vector.load %arg4[%c2_25, %c0_26] : memref<24x128xf32, #tpu.memory_space<vmem>>, vector<1x128xf32>
    tpu.vector_store %arg4[%c2_25, %c0_26], %496 {strides = array<i32>} : memref<24x128xf32, #tpu.memory_space<vmem>>, vector<1x128xf32>,
    %498 = arith.addf %360, %53 : vector<1x128xf32>
    %c10_27 = arith.constant 10 : index
    %c0_28 = arith.constant 0 : index
    %499 = vector.load %arg4[%c10_27, %c0_28] : memref<24x128xf32, #tpu.memory_space<vmem>>, vector<1x128xf32>
    tpu.vector_store %arg4[%c10_27, %c0_28], %498 {strides = array<i32>} : memref<24x128xf32, #tpu.memory_space<vmem>>, vector<1x128xf32>,
    %500 = arith.addf %369, %54 : vector<1x128xf32>
    %c18_29 = arith.constant 18 : index
    %c0_30 = arith.constant 0 : index
    %501 = vector.load %arg4[%c18_29, %c0_30] : memref<24x128xf32, #tpu.memory_space<vmem>>, vector<1x128xf32>
    tpu.vector_store %arg4[%c18_29, %c0_30], %500 {strides = array<i32>} : memref<24x128xf32, #tpu.memory_space<vmem>>, vector<1x128xf32>,
    %c39 = arith.constant 39 : index
    %502 = memref.load %arg1[%c39] : memref<96xf32, #tpu.memory_space<smem>>
    %c43 = arith.constant 43 : index
    %503 = memref.load %arg1[%c43] : memref<96xf32, #tpu.memory_space<smem>>
    %c47 = arith.constant 47 : index
    %504 = memref.load %arg1[%c47] : memref<96xf32, #tpu.memory_space<smem>>
    %505 = vector.broadcast %502 : f32 to vector<1x128xf32>
    %506 = arith.mulf %455, %505 : vector<1x128xf32>
    %507 = vector.broadcast %503 : f32 to vector<1x128xf32>
    %508 = arith.mulf %460, %507 : vector<1x128xf32>
    %509 = arith.addf %506, %508 : vector<1x128xf32>
    %510 = vector.broadcast %504 : f32 to vector<1x128xf32>
    %511 = arith.mulf %465, %510 : vector<1x128xf32>
    %512 = arith.addf %509, %511 : vector<1x128xf32>
    %513 = arith.addf %512, %351 : vector<1x128xf32>
    %514 = vector.broadcast %502 : f32 to vector<1x128xf32>
    %515 = arith.mulf %470, %514 : vector<1x128xf32>
    %516 = vector.broadcast %503 : f32 to vector<1x128xf32>
    %517 = arith.mulf %475, %516 : vector<1x128xf32>
    %518 = arith.addf %515, %517 : vector<1x128xf32>
    %519 = vector.broadcast %504 : f32 to vector<1x128xf32>
    %520 = arith.mulf %480, %519 : vector<1x128xf32>
    %521 = arith.addf %518, %520 : vector<1x128xf32>
    %522 = arith.addf %521, %360 : vector<1x128xf32>
    %523 = vector.broadcast %502 : f32 to vector<1x128xf32>
    %524 = arith.mulf %485, %523 : vector<1x128xf32>
    %525 = vector.broadcast %503 : f32 to vector<1x128xf32>
    %526 = arith.mulf %490, %525 : vector<1x128xf32>
    %527 = arith.addf %524, %526 : vector<1x128xf32>
    %528 = vector.broadcast %504 : f32 to vector<1x128xf32>
    %529 = arith.mulf %495, %528 : vector<1x128xf32>
    %530 = arith.addf %527, %529 : vector<1x128xf32>
    %531 = arith.addf %530, %369 : vector<1x128xf32>
    %532 = arith.addf %513, %52 : vector<1x128xf32>
    %c3_31 = arith.constant 3 : index
    %c0_32 = arith.constant 0 : index
    %533 = vector.load %arg4[%c3_31, %c0_32] : memref<24x128xf32, #tpu.memory_space<vmem>>, vector<1x128xf32>
    tpu.vector_store %arg4[%c3_31, %c0_32], %532 {strides = array<i32>} : memref<24x128xf32, #tpu.memory_space<vmem>>, vector<1x128xf32>,
    %534 = arith.addf %522, %53 : vector<1x128xf32>
    %c11_33 = arith.constant 11 : index
    %c0_34 = arith.constant 0 : index
    %535 = vector.load %arg4[%c11_33, %c0_34] : memref<24x128xf32, #tpu.memory_space<vmem>>, vector<1x128xf32>
    tpu.vector_store %arg4[%c11_33, %c0_34], %534 {strides = array<i32>} : memref<24x128xf32, #tpu.memory_space<vmem>>, vector<1x128xf32>,
    %536 = arith.addf %531, %54 : vector<1x128xf32>
    %c19_35 = arith.constant 19 : index
    %c0_36 = arith.constant 0 : index
    %537 = vector.load %arg4[%c19_35, %c0_36] : memref<24x128xf32, #tpu.memory_space<vmem>>, vector<1x128xf32>
    tpu.vector_store %arg4[%c19_35, %c0_36], %536 {strides = array<i32>} : memref<24x128xf32, #tpu.memory_space<vmem>>, vector<1x128xf32>,
    %c48 = arith.constant 48 : index
    %538 = memref.load %arg1[%c48] : memref<96xf32, #tpu.memory_space<smem>>
    %c49 = arith.constant 49 : index
    %539 = memref.load %arg1[%c49] : memref<96xf32, #tpu.memory_space<smem>>
    %c50 = arith.constant 50 : index
    %540 = memref.load %arg1[%c50] : memref<96xf32, #tpu.memory_space<smem>>
    %c52 = arith.constant 52 : index
    %541 = memref.load %arg1[%c52] : memref<96xf32, #tpu.memory_space<smem>>
    %c53 = arith.constant 53 : index
    %542 = memref.load %arg1[%c53] : memref<96xf32, #tpu.memory_space<smem>>
    %c54 = arith.constant 54 : index
    %543 = memref.load %arg1[%c54] : memref<96xf32, #tpu.memory_space<smem>>
    %c56 = arith.constant 56 : index
    %544 = memref.load %arg1[%c56] : memref<96xf32, #tpu.memory_space<smem>>
    %c57 = arith.constant 57 : index
    %545 = memref.load %arg1[%c57] : memref<96xf32, #tpu.memory_space<smem>>
    %c58 = arith.constant 58 : index
    %546 = memref.load %arg1[%c58] : memref<96xf32, #tpu.memory_space<smem>>
    %c51 = arith.constant 51 : index
    %547 = memref.load %arg1[%c51] : memref<96xf32, #tpu.memory_space<smem>>
    %c55 = arith.constant 55 : index
    %548 = memref.load %arg1[%c55] : memref<96xf32, #tpu.memory_space<smem>>
    %c59 = arith.constant 59 : index
    %549 = memref.load %arg1[%c59] : memref<96xf32, #tpu.memory_space<smem>>
    %550 = vector.broadcast %547 : f32 to vector<1x128xf32>
    %551 = arith.mulf %284, %550 : vector<1x128xf32>
    %552 = vector.broadcast %548 : f32 to vector<1x128xf32>
    %553 = arith.mulf %289, %552 : vector<1x128xf32>
    %554 = arith.addf %551, %553 : vector<1x128xf32>
    %555 = vector.broadcast %549 : f32 to vector<1x128xf32>
    %556 = arith.mulf %294, %555 : vector<1x128xf32>
    %557 = arith.addf %554, %556 : vector<1x128xf32>
    %558 = arith.addf %557, %178 : vector<1x128xf32>
    %559 = vector.broadcast %547 : f32 to vector<1x128xf32>
    %560 = arith.mulf %299, %559 : vector<1x128xf32>
    %561 = vector.broadcast %548 : f32 to vector<1x128xf32>
    %562 = arith.mulf %304, %561 : vector<1x128xf32>
    %563 = arith.addf %560, %562 : vector<1x128xf32>
    %564 = vector.broadcast %549 : f32 to vector<1x128xf32>
    %565 = arith.mulf %309, %564 : vector<1x128xf32>
    %566 = arith.addf %563, %565 : vector<1x128xf32>
    %567 = arith.addf %566, %188 : vector<1x128xf32>
    %568 = vector.broadcast %547 : f32 to vector<1x128xf32>
    %569 = arith.mulf %314, %568 : vector<1x128xf32>
    %570 = vector.broadcast %548 : f32 to vector<1x128xf32>
    %571 = arith.mulf %319, %570 : vector<1x128xf32>
    %572 = arith.addf %569, %571 : vector<1x128xf32>
    %573 = vector.broadcast %549 : f32 to vector<1x128xf32>
    %574 = arith.mulf %324, %573 : vector<1x128xf32>
    %575 = arith.addf %572, %574 : vector<1x128xf32>
    %576 = arith.addf %575, %198 : vector<1x128xf32>
    %577 = vector.extract_strided_slice %21 {offsets = [4, 0], sizes = [1, 128], strides = [1, 1]} : vector<8x128xf32> to vector<1x128xf32>
    %578 = vector.extract_strided_slice %25 {offsets = [4, 0], sizes = [1, 128], strides = [1, 1]} : vector<8x128xf32> to vector<1x128xf32>
    %579 = vector.extract_strided_slice %29 {offsets = [4, 0], sizes = [1, 128], strides = [1, 1]} : vector<8x128xf32> to vector<1x128xf32>
    %580 = vector.extract_strided_slice %33 {offsets = [4, 0], sizes = [1, 128], strides = [1, 1]} : vector<8x128xf32> to vector<1x128xf32>
    %581 = vector.extract_strided_slice %36 {offsets = [4, 0], sizes = [1, 128], strides = [1, 1]} : vector<8x128xf32> to vector<1x128xf32>
    %582 = vector.extract_strided_slice %40 {offsets = [4, 0], sizes = [1, 128], strides = [1, 1]} : vector<8x128xf32> to vector<1x128xf32>
    %583 = vector.extract_strided_slice %44 {offsets = [4, 0], sizes = [1, 128], strides = [1, 1]} : vector<8x128xf32> to vector<1x128xf32>
    %584 = vector.extract_strided_slice %48 {offsets = [4, 0], sizes = [1, 128], strides = [1, 1]} : vector<8x128xf32> to vector<1x128xf32>
    %585 = vector.extract_strided_slice %51 {offsets = [4, 0], sizes = [1, 128], strides = [1, 1]} : vector<8x128xf32> to vector<1x128xf32>
    %586 = vector.broadcast %538 : f32 to vector<1x128xf32>
    %587 = arith.mulf %586, %577 : vector<1x128xf32>
    %588 = vector.broadcast %539 : f32 to vector<1x128xf32>
    %589 = arith.mulf %588, %580 : vector<1x128xf32>
    %590 = arith.addf %587, %589 : vector<1x128xf32>
    %591 = vector.broadcast %540 : f32 to vector<1x128xf32>
    %592 = arith.mulf %591, %583 : vector<1x128xf32>
    %593 = arith.addf %590, %592 : vector<1x128xf32>
    %594 = vector.broadcast %538 : f32 to vector<1x128xf32>
    %595 = arith.mulf %594, %578 : vector<1x128xf32>
    %596 = vector.broadcast %539 : f32 to vector<1x128xf32>
    %597 = arith.mulf %596, %581 : vector<1x128xf32>
    %598 = arith.addf %595, %597 : vector<1x128xf32>
    %599 = vector.broadcast %540 : f32 to vector<1x128xf32>
    %600 = arith.mulf %599, %584 : vector<1x128xf32>
    %601 = arith.addf %598, %600 : vector<1x128xf32>
    %602 = vector.broadcast %538 : f32 to vector<1x128xf32>
    %603 = arith.mulf %602, %579 : vector<1x128xf32>
    %604 = vector.broadcast %539 : f32 to vector<1x128xf32>
    %605 = arith.mulf %604, %582 : vector<1x128xf32>
    %606 = arith.addf %603, %605 : vector<1x128xf32>
    %607 = vector.broadcast %540 : f32 to vector<1x128xf32>
    %608 = arith.mulf %607, %585 : vector<1x128xf32>
    %609 = arith.addf %606, %608 : vector<1x128xf32>
    %610 = vector.broadcast %541 : f32 to vector<1x128xf32>
    %611 = arith.mulf %610, %577 : vector<1x128xf32>
    %612 = vector.broadcast %542 : f32 to vector<1x128xf32>
    %613 = arith.mulf %612, %580 : vector<1x128xf32>
    %614 = arith.addf %611, %613 : vector<1x128xf32>
    %615 = vector.broadcast %543 : f32 to vector<1x128xf32>
    %616 = arith.mulf %615, %583 : vector<1x128xf32>
    %617 = arith.addf %614, %616 : vector<1x128xf32>
    %618 = vector.broadcast %541 : f32 to vector<1x128xf32>
    %619 = arith.mulf %618, %578 : vector<1x128xf32>
    %620 = vector.broadcast %542 : f32 to vector<1x128xf32>
    %621 = arith.mulf %620, %581 : vector<1x128xf32>
    %622 = arith.addf %619, %621 : vector<1x128xf32>
    %623 = vector.broadcast %543 : f32 to vector<1x128xf32>
    %624 = arith.mulf %623, %584 : vector<1x128xf32>
    %625 = arith.addf %622, %624 : vector<1x128xf32>
    %626 = vector.broadcast %541 : f32 to vector<1x128xf32>
    %627 = arith.mulf %626, %579 : vector<1x128xf32>
    %628 = vector.broadcast %542 : f32 to vector<1x128xf32>
    %629 = arith.mulf %628, %582 : vector<1x128xf32>
    %630 = arith.addf %627, %629 : vector<1x128xf32>
    %631 = vector.broadcast %543 : f32 to vector<1x128xf32>
    %632 = arith.mulf %631, %585 : vector<1x128xf32>
    %633 = arith.addf %630, %632 : vector<1x128xf32>
    %634 = vector.broadcast %544 : f32 to vector<1x128xf32>
    %635 = arith.mulf %634, %577 : vector<1x128xf32>
    %636 = vector.broadcast %545 : f32 to vector<1x128xf32>
    %637 = arith.mulf %636, %580 : vector<1x128xf32>
    %638 = arith.addf %635, %637 : vector<1x128xf32>
    %639 = vector.broadcast %546 : f32 to vector<1x128xf32>
    %640 = arith.mulf %639, %583 : vector<1x128xf32>
    %641 = arith.addf %638, %640 : vector<1x128xf32>
    %642 = vector.broadcast %544 : f32 to vector<1x128xf32>
    %643 = arith.mulf %642, %578 : vector<1x128xf32>
    %644 = vector.broadcast %545 : f32 to vector<1x128xf32>
    %645 = arith.mulf %644, %581 : vector<1x128xf32>
    %646 = arith.addf %643, %645 : vector<1x128xf32>
    %647 = vector.broadcast %546 : f32 to vector<1x128xf32>
    %648 = arith.mulf %647, %584 : vector<1x128xf32>
    %649 = arith.addf %646, %648 : vector<1x128xf32>
    %650 = vector.broadcast %544 : f32 to vector<1x128xf32>
    %651 = arith.mulf %650, %579 : vector<1x128xf32>
    %652 = vector.broadcast %545 : f32 to vector<1x128xf32>
    %653 = arith.mulf %652, %582 : vector<1x128xf32>
    %654 = arith.addf %651, %653 : vector<1x128xf32>
    %655 = vector.broadcast %546 : f32 to vector<1x128xf32>
    %656 = arith.mulf %655, %585 : vector<1x128xf32>
    %657 = arith.addf %654, %656 : vector<1x128xf32>
    %658 = arith.mulf %284, %593 : vector<1x128xf32>
    %659 = arith.mulf %289, %617 : vector<1x128xf32>
    %660 = arith.addf %658, %659 : vector<1x128xf32>
    %661 = arith.mulf %294, %641 : vector<1x128xf32>
    %662 = arith.addf %660, %661 : vector<1x128xf32>
    %663 = arith.mulf %284, %601 : vector<1x128xf32>
    %664 = arith.mulf %289, %625 : vector<1x128xf32>
    %665 = arith.addf %663, %664 : vector<1x128xf32>
    %666 = arith.mulf %294, %649 : vector<1x128xf32>
    %667 = arith.addf %665, %666 : vector<1x128xf32>
    %668 = arith.mulf %284, %609 : vector<1x128xf32>
    %669 = arith.mulf %289, %633 : vector<1x128xf32>
    %670 = arith.addf %668, %669 : vector<1x128xf32>
    %671 = arith.mulf %294, %657 : vector<1x128xf32>
    %672 = arith.addf %670, %671 : vector<1x128xf32>
    %673 = arith.mulf %299, %593 : vector<1x128xf32>
    %674 = arith.mulf %304, %617 : vector<1x128xf32>
    %675 = arith.addf %673, %674 : vector<1x128xf32>
    %676 = arith.mulf %309, %641 : vector<1x128xf32>
    %677 = arith.addf %675, %676 : vector<1x128xf32>
    %678 = arith.mulf %299, %601 : vector<1x128xf32>
    %679 = arith.mulf %304, %625 : vector<1x128xf32>
    %680 = arith.addf %678, %679 : vector<1x128xf32>
    %681 = arith.mulf %309, %649 : vector<1x128xf32>
    %682 = arith.addf %680, %681 : vector<1x128xf32>
    %683 = arith.mulf %299, %609 : vector<1x128xf32>
    %684 = arith.mulf %304, %633 : vector<1x128xf32>
    %685 = arith.addf %683, %684 : vector<1x128xf32>
    %686 = arith.mulf %309, %657 : vector<1x128xf32>
    %687 = arith.addf %685, %686 : vector<1x128xf32>
    %688 = arith.mulf %314, %593 : vector<1x128xf32>
    %689 = arith.mulf %319, %617 : vector<1x128xf32>
    %690 = arith.addf %688, %689 : vector<1x128xf32>
    %691 = arith.mulf %324, %641 : vector<1x128xf32>
    %692 = arith.addf %690, %691 : vector<1x128xf32>
    %693 = arith.mulf %314, %601 : vector<1x128xf32>
    %694 = arith.mulf %319, %625 : vector<1x128xf32>
    %695 = arith.addf %693, %694 : vector<1x128xf32>
    %696 = arith.mulf %324, %649 : vector<1x128xf32>
    %697 = arith.addf %695, %696 : vector<1x128xf32>
    %698 = arith.mulf %314, %609 : vector<1x128xf32>
    %699 = arith.mulf %319, %633 : vector<1x128xf32>
    %700 = arith.addf %698, %699 : vector<1x128xf32>
    %701 = arith.mulf %324, %657 : vector<1x128xf32>
    %702 = arith.addf %700, %701 : vector<1x128xf32>
    %703 = arith.addf %558, %52 : vector<1x128xf32>
    %c4_37 = arith.constant 4 : index
    %c0_38 = arith.constant 0 : index
    %704 = vector.load %arg4[%c4_37, %c0_38] : memref<24x128xf32, #tpu.memory_space<vmem>>, vector<1x128xf32>
    tpu.vector_store %arg4[%c4_37, %c0_38], %703 {strides = array<i32>} : memref<24x128xf32, #tpu.memory_space<vmem>>, vector<1x128xf32>,
    %705 = arith.addf %567, %53 : vector<1x128xf32>
    %c12_39 = arith.constant 12 : index
    %c0_40 = arith.constant 0 : index
    %706 = vector.load %arg4[%c12_39, %c0_40] : memref<24x128xf32, #tpu.memory_space<vmem>>, vector<1x128xf32>
    tpu.vector_store %arg4[%c12_39, %c0_40], %705 {strides = array<i32>} : memref<24x128xf32, #tpu.memory_space<vmem>>, vector<1x128xf32>,
    %707 = arith.addf %576, %54 : vector<1x128xf32>
    %c20_41 = arith.constant 20 : index
    %c0_42 = arith.constant 0 : index
    %708 = vector.load %arg4[%c20_41, %c0_42] : memref<24x128xf32, #tpu.memory_space<vmem>>, vector<1x128xf32>
    tpu.vector_store %arg4[%c20_41, %c0_42], %707 {strides = array<i32>} : memref<24x128xf32, #tpu.memory_space<vmem>>, vector<1x128xf32>,
    %c63 = arith.constant 63 : index
    %709 = memref.load %arg1[%c63] : memref<96xf32, #tpu.memory_space<smem>>
    %c67 = arith.constant 67 : index
    %710 = memref.load %arg1[%c67] : memref<96xf32, #tpu.memory_space<smem>>
    %c71 = arith.constant 71 : index
    %711 = memref.load %arg1[%c71] : memref<96xf32, #tpu.memory_space<smem>>
    %712 = vector.broadcast %709 : f32 to vector<1x128xf32>
    %713 = arith.mulf %662, %712 : vector<1x128xf32>
    %714 = vector.broadcast %710 : f32 to vector<1x128xf32>
    %715 = arith.mulf %667, %714 : vector<1x128xf32>
    %716 = arith.addf %713, %715 : vector<1x128xf32>
    %717 = vector.broadcast %711 : f32 to vector<1x128xf32>
    %718 = arith.mulf %672, %717 : vector<1x128xf32>
    %719 = arith.addf %716, %718 : vector<1x128xf32>
    %720 = arith.addf %719, %558 : vector<1x128xf32>
    %721 = vector.broadcast %709 : f32 to vector<1x128xf32>
    %722 = arith.mulf %677, %721 : vector<1x128xf32>
    %723 = vector.broadcast %710 : f32 to vector<1x128xf32>
    %724 = arith.mulf %682, %723 : vector<1x128xf32>
    %725 = arith.addf %722, %724 : vector<1x128xf32>
    %726 = vector.broadcast %711 : f32 to vector<1x128xf32>
    %727 = arith.mulf %687, %726 : vector<1x128xf32>
    %728 = arith.addf %725, %727 : vector<1x128xf32>
    %729 = arith.addf %728, %567 : vector<1x128xf32>
    %730 = vector.broadcast %709 : f32 to vector<1x128xf32>
    %731 = arith.mulf %692, %730 : vector<1x128xf32>
    %732 = vector.broadcast %710 : f32 to vector<1x128xf32>
    %733 = arith.mulf %697, %732 : vector<1x128xf32>
    %734 = arith.addf %731, %733 : vector<1x128xf32>
    %735 = vector.broadcast %711 : f32 to vector<1x128xf32>
    %736 = arith.mulf %702, %735 : vector<1x128xf32>
    %737 = arith.addf %734, %736 : vector<1x128xf32>
    %738 = arith.addf %737, %576 : vector<1x128xf32>
    %739 = arith.addf %720, %52 : vector<1x128xf32>
    %c5_43 = arith.constant 5 : index
    %c0_44 = arith.constant 0 : index
    %740 = vector.load %arg4[%c5_43, %c0_44] : memref<24x128xf32, #tpu.memory_space<vmem>>, vector<1x128xf32>
    tpu.vector_store %arg4[%c5_43, %c0_44], %739 {strides = array<i32>} : memref<24x128xf32, #tpu.memory_space<vmem>>, vector<1x128xf32>,
    %741 = arith.addf %729, %53 : vector<1x128xf32>
    %c13_45 = arith.constant 13 : index
    %c0_46 = arith.constant 0 : index
    %742 = vector.load %arg4[%c13_45, %c0_46] : memref<24x128xf32, #tpu.memory_space<vmem>>, vector<1x128xf32>
    tpu.vector_store %arg4[%c13_45, %c0_46], %741 {strides = array<i32>} : memref<24x128xf32, #tpu.memory_space<vmem>>, vector<1x128xf32>,
    %743 = arith.addf %738, %54 : vector<1x128xf32>
    %c21_47 = arith.constant 21 : index
    %c0_48 = arith.constant 0 : index
    %744 = vector.load %arg4[%c21_47, %c0_48] : memref<24x128xf32, #tpu.memory_space<vmem>>, vector<1x128xf32>
    tpu.vector_store %arg4[%c21_47, %c0_48], %743 {strides = array<i32>} : memref<24x128xf32, #tpu.memory_space<vmem>>, vector<1x128xf32>,
    %c72 = arith.constant 72 : index
    %745 = memref.load %arg1[%c72] : memref<96xf32, #tpu.memory_space<smem>>
    %c73 = arith.constant 73 : index
    %746 = memref.load %arg1[%c73] : memref<96xf32, #tpu.memory_space<smem>>
    %c74 = arith.constant 74 : index
    %747 = memref.load %arg1[%c74] : memref<96xf32, #tpu.memory_space<smem>>
    %c76 = arith.constant 76 : index
    %748 = memref.load %arg1[%c76] : memref<96xf32, #tpu.memory_space<smem>>
    %c77 = arith.constant 77 : index
    %749 = memref.load %arg1[%c77] : memref<96xf32, #tpu.memory_space<smem>>
    %c78 = arith.constant 78 : index
    %750 = memref.load %arg1[%c78] : memref<96xf32, #tpu.memory_space<smem>>
    %c80 = arith.constant 80 : index
    %751 = memref.load %arg1[%c80] : memref<96xf32, #tpu.memory_space<smem>>
    %c81 = arith.constant 81 : index
    %752 = memref.load %arg1[%c81] : memref<96xf32, #tpu.memory_space<smem>>
    %c82 = arith.constant 82 : index
    %753 = memref.load %arg1[%c82] : memref<96xf32, #tpu.memory_space<smem>>
    %c75 = arith.constant 75 : index
    %754 = memref.load %arg1[%c75] : memref<96xf32, #tpu.memory_space<smem>>
    %c79 = arith.constant 79 : index
    %755 = memref.load %arg1[%c79] : memref<96xf32, #tpu.memory_space<smem>>
    %c83 = arith.constant 83 : index
    %756 = memref.load %arg1[%c83] : memref<96xf32, #tpu.memory_space<smem>>
    %757 = vector.broadcast %754 : f32 to vector<1x128xf32>
    %758 = arith.mulf %83, %757 : vector<1x128xf32>
    %759 = vector.broadcast %755 : f32 to vector<1x128xf32>
    %760 = arith.mulf %91, %759 : vector<1x128xf32>
    %761 = arith.addf %758, %760 : vector<1x128xf32>
    %762 = vector.broadcast %756 : f32 to vector<1x128xf32>
    %763 = arith.mulf %99, %762 : vector<1x128xf32>
    %764 = arith.addf %761, %763 : vector<1x128xf32>
    %765 = vector.broadcast %64 : f32 to vector<1x128xf32>
    %766 = arith.addf %764, %765 : vector<1x128xf32>
    %767 = vector.broadcast %754 : f32 to vector<1x128xf32>
    %768 = arith.mulf %107, %767 : vector<1x128xf32>
    %769 = vector.broadcast %755 : f32 to vector<1x128xf32>
    %770 = arith.mulf %115, %769 : vector<1x128xf32>
    %771 = arith.addf %768, %770 : vector<1x128xf32>
    %772 = vector.broadcast %756 : f32 to vector<1x128xf32>
    %773 = arith.mulf %123, %772 : vector<1x128xf32>
    %774 = arith.addf %771, %773 : vector<1x128xf32>
    %775 = vector.broadcast %65 : f32 to vector<1x128xf32>
    %776 = arith.addf %774, %775 : vector<1x128xf32>
    %777 = vector.broadcast %754 : f32 to vector<1x128xf32>
    %778 = arith.mulf %131, %777 : vector<1x128xf32>
    %779 = vector.broadcast %755 : f32 to vector<1x128xf32>
    %780 = arith.mulf %139, %779 : vector<1x128xf32>
    %781 = arith.addf %778, %780 : vector<1x128xf32>
    %782 = vector.broadcast %756 : f32 to vector<1x128xf32>
    %783 = arith.mulf %147, %782 : vector<1x128xf32>
    %784 = arith.addf %781, %783 : vector<1x128xf32>
    %785 = vector.broadcast %66 : f32 to vector<1x128xf32>
    %786 = arith.addf %784, %785 : vector<1x128xf32>
    %787 = vector.extract_strided_slice %21 {offsets = [6, 0], sizes = [1, 128], strides = [1, 1]} : vector<8x128xf32> to vector<1x128xf32>
    %788 = vector.extract_strided_slice %25 {offsets = [6, 0], sizes = [1, 128], strides = [1, 1]} : vector<8x128xf32> to vector<1x128xf32>
    %789 = vector.extract_strided_slice %29 {offsets = [6, 0], sizes = [1, 128], strides = [1, 1]} : vector<8x128xf32> to vector<1x128xf32>
    %790 = vector.extract_strided_slice %33 {offsets = [6, 0], sizes = [1, 128], strides = [1, 1]} : vector<8x128xf32> to vector<1x128xf32>
    %791 = vector.extract_strided_slice %36 {offsets = [6, 0], sizes = [1, 128], strides = [1, 1]} : vector<8x128xf32> to vector<1x128xf32>
    %792 = vector.extract_strided_slice %40 {offsets = [6, 0], sizes = [1, 128], strides = [1, 1]} : vector<8x128xf32> to vector<1x128xf32>
    %793 = vector.extract_strided_slice %44 {offsets = [6, 0], sizes = [1, 128], strides = [1, 1]} : vector<8x128xf32> to vector<1x128xf32>
    %794 = vector.extract_strided_slice %48 {offsets = [6, 0], sizes = [1, 128], strides = [1, 1]} : vector<8x128xf32> to vector<1x128xf32>
    %795 = vector.extract_strided_slice %51 {offsets = [6, 0], sizes = [1, 128], strides = [1, 1]} : vector<8x128xf32> to vector<1x128xf32>
    %796 = vector.broadcast %745 : f32 to vector<1x128xf32>
    %797 = arith.mulf %796, %787 : vector<1x128xf32>
    %798 = vector.broadcast %746 : f32 to vector<1x128xf32>
    %799 = arith.mulf %798, %790 : vector<1x128xf32>
    %800 = arith.addf %797, %799 : vector<1x128xf32>
    %801 = vector.broadcast %747 : f32 to vector<1x128xf32>
    %802 = arith.mulf %801, %793 : vector<1x128xf32>
    %803 = arith.addf %800, %802 : vector<1x128xf32>
    %804 = vector.broadcast %745 : f32 to vector<1x128xf32>
    %805 = arith.mulf %804, %788 : vector<1x128xf32>
    %806 = vector.broadcast %746 : f32 to vector<1x128xf32>
    %807 = arith.mulf %806, %791 : vector<1x128xf32>
    %808 = arith.addf %805, %807 : vector<1x128xf32>
    %809 = vector.broadcast %747 : f32 to vector<1x128xf32>
    %810 = arith.mulf %809, %794 : vector<1x128xf32>
    %811 = arith.addf %808, %810 : vector<1x128xf32>
    %812 = vector.broadcast %745 : f32 to vector<1x128xf32>
    %813 = arith.mulf %812, %789 : vector<1x128xf32>
    %814 = vector.broadcast %746 : f32 to vector<1x128xf32>
    %815 = arith.mulf %814, %792 : vector<1x128xf32>
    %816 = arith.addf %813, %815 : vector<1x128xf32>
    %817 = vector.broadcast %747 : f32 to vector<1x128xf32>
    %818 = arith.mulf %817, %795 : vector<1x128xf32>
    %819 = arith.addf %816, %818 : vector<1x128xf32>
    %820 = vector.broadcast %748 : f32 to vector<1x128xf32>
    %821 = arith.mulf %820, %787 : vector<1x128xf32>
    %822 = vector.broadcast %749 : f32 to vector<1x128xf32>
    %823 = arith.mulf %822, %790 : vector<1x128xf32>
    %824 = arith.addf %821, %823 : vector<1x128xf32>
    %825 = vector.broadcast %750 : f32 to vector<1x128xf32>
    %826 = arith.mulf %825, %793 : vector<1x128xf32>
    %827 = arith.addf %824, %826 : vector<1x128xf32>
    %828 = vector.broadcast %748 : f32 to vector<1x128xf32>
    %829 = arith.mulf %828, %788 : vector<1x128xf32>
    %830 = vector.broadcast %749 : f32 to vector<1x128xf32>
    %831 = arith.mulf %830, %791 : vector<1x128xf32>
    %832 = arith.addf %829, %831 : vector<1x128xf32>
    %833 = vector.broadcast %750 : f32 to vector<1x128xf32>
    %834 = arith.mulf %833, %794 : vector<1x128xf32>
    %835 = arith.addf %832, %834 : vector<1x128xf32>
    %836 = vector.broadcast %748 : f32 to vector<1x128xf32>
    %837 = arith.mulf %836, %789 : vector<1x128xf32>
    %838 = vector.broadcast %749 : f32 to vector<1x128xf32>
    %839 = arith.mulf %838, %792 : vector<1x128xf32>
    %840 = arith.addf %837, %839 : vector<1x128xf32>
    %841 = vector.broadcast %750 : f32 to vector<1x128xf32>
    %842 = arith.mulf %841, %795 : vector<1x128xf32>
    %843 = arith.addf %840, %842 : vector<1x128xf32>
    %844 = vector.broadcast %751 : f32 to vector<1x128xf32>
    %845 = arith.mulf %844, %787 : vector<1x128xf32>
    %846 = vector.broadcast %752 : f32 to vector<1x128xf32>
    %847 = arith.mulf %846, %790 : vector<1x128xf32>
    %848 = arith.addf %845, %847 : vector<1x128xf32>
    %849 = vector.broadcast %753 : f32 to vector<1x128xf32>
    %850 = arith.mulf %849, %793 : vector<1x128xf32>
    %851 = arith.addf %848, %850 : vector<1x128xf32>
    %852 = vector.broadcast %751 : f32 to vector<1x128xf32>
    %853 = arith.mulf %852, %788 : vector<1x128xf32>
    %854 = vector.broadcast %752 : f32 to vector<1x128xf32>
    %855 = arith.mulf %854, %791 : vector<1x128xf32>
    %856 = arith.addf %853, %855 : vector<1x128xf32>
    %857 = vector.broadcast %753 : f32 to vector<1x128xf32>
    %858 = arith.mulf %857, %794 : vector<1x128xf32>
    %859 = arith.addf %856, %858 : vector<1x128xf32>
    %860 = vector.broadcast %751 : f32 to vector<1x128xf32>
    %861 = arith.mulf %860, %789 : vector<1x128xf32>
    %862 = vector.broadcast %752 : f32 to vector<1x128xf32>
    %863 = arith.mulf %862, %792 : vector<1x128xf32>
    %864 = arith.addf %861, %863 : vector<1x128xf32>
    %865 = vector.broadcast %753 : f32 to vector<1x128xf32>
    %866 = arith.mulf %865, %795 : vector<1x128xf32>
    %867 = arith.addf %864, %866 : vector<1x128xf32>
    %868 = arith.mulf %83, %803 : vector<1x128xf32>
    %869 = arith.mulf %91, %827 : vector<1x128xf32>
    %870 = arith.addf %868, %869 : vector<1x128xf32>
    %871 = arith.mulf %99, %851 : vector<1x128xf32>
    %872 = arith.addf %870, %871 : vector<1x128xf32>
    %873 = arith.mulf %83, %811 : vector<1x128xf32>
    %874 = arith.mulf %91, %835 : vector<1x128xf32>
    %875 = arith.addf %873, %874 : vector<1x128xf32>
    %876 = arith.mulf %99, %859 : vector<1x128xf32>
    %877 = arith.addf %875, %876 : vector<1x128xf32>
    %878 = arith.mulf %83, %819 : vector<1x128xf32>
    %879 = arith.mulf %91, %843 : vector<1x128xf32>
    %880 = arith.addf %878, %879 : vector<1x128xf32>
    %881 = arith.mulf %99, %867 : vector<1x128xf32>
    %882 = arith.addf %880, %881 : vector<1x128xf32>
    %883 = arith.mulf %107, %803 : vector<1x128xf32>
    %884 = arith.mulf %115, %827 : vector<1x128xf32>
    %885 = arith.addf %883, %884 : vector<1x128xf32>
    %886 = arith.mulf %123, %851 : vector<1x128xf32>
    %887 = arith.addf %885, %886 : vector<1x128xf32>
    %888 = arith.mulf %107, %811 : vector<1x128xf32>
    %889 = arith.mulf %115, %835 : vector<1x128xf32>
    %890 = arith.addf %888, %889 : vector<1x128xf32>
    %891 = arith.mulf %123, %859 : vector<1x128xf32>
    %892 = arith.addf %890, %891 : vector<1x128xf32>
    %893 = arith.mulf %107, %819 : vector<1x128xf32>
    %894 = arith.mulf %115, %843 : vector<1x128xf32>
    %895 = arith.addf %893, %894 : vector<1x128xf32>
    %896 = arith.mulf %123, %867 : vector<1x128xf32>
    %897 = arith.addf %895, %896 : vector<1x128xf32>
    %898 = arith.mulf %131, %803 : vector<1x128xf32>
    %899 = arith.mulf %139, %827 : vector<1x128xf32>
    %900 = arith.addf %898, %899 : vector<1x128xf32>
    %901 = arith.mulf %147, %851 : vector<1x128xf32>
    %902 = arith.addf %900, %901 : vector<1x128xf32>
    %903 = arith.mulf %131, %811 : vector<1x128xf32>
    %904 = arith.mulf %139, %835 : vector<1x128xf32>
    %905 = arith.addf %903, %904 : vector<1x128xf32>
    %906 = arith.mulf %147, %859 : vector<1x128xf32>
    %907 = arith.addf %905, %906 : vector<1x128xf32>
    %908 = arith.mulf %131, %819 : vector<1x128xf32>
    %909 = arith.mulf %139, %843 : vector<1x128xf32>
    %910 = arith.addf %908, %909 : vector<1x128xf32>
    %911 = arith.mulf %147, %867 : vector<1x128xf32>
    %912 = arith.addf %910, %911 : vector<1x128xf32>
    %913 = arith.addf %766, %52 : vector<1x128xf32>
    %c6_49 = arith.constant 6 : index
    %c0_50 = arith.constant 0 : index
    %914 = vector.load %arg4[%c6_49, %c0_50] : memref<24x128xf32, #tpu.memory_space<vmem>>, vector<1x128xf32>
    tpu.vector_store %arg4[%c6_49, %c0_50], %913 {strides = array<i32>} : memref<24x128xf32, #tpu.memory_space<vmem>>, vector<1x128xf32>,
    %915 = arith.addf %776, %53 : vector<1x128xf32>
    %c14_51 = arith.constant 14 : index
    %c0_52 = arith.constant 0 : index
    %916 = vector.load %arg4[%c14_51, %c0_52] : memref<24x128xf32, #tpu.memory_space<vmem>>, vector<1x128xf32>
    tpu.vector_store %arg4[%c14_51, %c0_52], %915 {strides = array<i32>} : memref<24x128xf32, #tpu.memory_space<vmem>>, vector<1x128xf32>,
    %917 = arith.addf %786, %54 : vector<1x128xf32>
    %c22_53 = arith.constant 22 : index
    %c0_54 = arith.constant 0 : index
    %918 = vector.load %arg4[%c22_53, %c0_54] : memref<24x128xf32, #tpu.memory_space<vmem>>, vector<1x128xf32>
    tpu.vector_store %arg4[%c22_53, %c0_54], %917 {strides = array<i32>} : memref<24x128xf32, #tpu.memory_space<vmem>>, vector<1x128xf32>,
    %c87 = arith.constant 87 : index
    %919 = memref.load %arg1[%c87] : memref<96xf32, #tpu.memory_space<smem>>
    %c91 = arith.constant 91 : index
    %920 = memref.load %arg1[%c91] : memref<96xf32, #tpu.memory_space<smem>>
    %c95 = arith.constant 95 : index
    %921 = memref.load %arg1[%c95] : memref<96xf32, #tpu.memory_space<smem>>
    %922 = vector.broadcast %919 : f32 to vector<1x128xf32>
    %923 = arith.mulf %872, %922 : vector<1x128xf32>
    %924 = vector.broadcast %920 : f32 to vector<1x128xf32>
    %925 = arith.mulf %877, %924 : vector<1x128xf32>
    %926 = arith.addf %923, %925 : vector<1x128xf32>
    %927 = vector.broadcast %921 : f32 to vector<1x128xf32>
    %928 = arith.mulf %882, %927 : vector<1x128xf32>
    %929 = arith.addf %926, %928 : vector<1x128xf32>
    %930 = arith.addf %929, %766 : vector<1x128xf32>
    %931 = vector.broadcast %919 : f32 to vector<1x128xf32>
    %932 = arith.mulf %887, %931 : vector<1x128xf32>
    %933 = vector.broadcast %920 : f32 to vector<1x128xf32>
    %934 = arith.mulf %892, %933 : vector<1x128xf32>
    %935 = arith.addf %932, %934 : vector<1x128xf32>
    %936 = vector.broadcast %921 : f32 to vector<1x128xf32>
    %937 = arith.mulf %897, %936 : vector<1x128xf32>
    %938 = arith.addf %935, %937 : vector<1x128xf32>
    %939 = arith.addf %938, %776 : vector<1x128xf32>
    %940 = vector.broadcast %919 : f32 to vector<1x128xf32>
    %941 = arith.mulf %902, %940 : vector<1x128xf32>
    %942 = vector.broadcast %920 : f32 to vector<1x128xf32>
    %943 = arith.mulf %907, %942 : vector<1x128xf32>
    %944 = arith.addf %941, %943 : vector<1x128xf32>
    %945 = vector.broadcast %921 : f32 to vector<1x128xf32>
    %946 = arith.mulf %912, %945 : vector<1x128xf32>
    %947 = arith.addf %944, %946 : vector<1x128xf32>
    %948 = arith.addf %947, %786 : vector<1x128xf32>
    %949 = arith.addf %930, %52 : vector<1x128xf32>
    %c7_55 = arith.constant 7 : index
    %c0_56 = arith.constant 0 : index
    %950 = vector.load %arg4[%c7_55, %c0_56] : memref<24x128xf32, #tpu.memory_space<vmem>>, vector<1x128xf32>
    tpu.vector_store %arg4[%c7_55, %c0_56], %949 {strides = array<i32>} : memref<24x128xf32, #tpu.memory_space<vmem>>, vector<1x128xf32>,
    %951 = arith.addf %939, %53 : vector<1x128xf32>
    %c15_57 = arith.constant 15 : index
    %c0_58 = arith.constant 0 : index
    %952 = vector.load %arg4[%c15_57, %c0_58] : memref<24x128xf32, #tpu.memory_space<vmem>>, vector<1x128xf32>
    tpu.vector_store %arg4[%c15_57, %c0_58], %951 {strides = array<i32>} : memref<24x128xf32, #tpu.memory_space<vmem>>, vector<1x128xf32>,
    %953 = arith.addf %948, %54 : vector<1x128xf32>
    %c23_59 = arith.constant 23 : index
    %c0_60 = arith.constant 0 : index
    %954 = vector.load %arg4[%c23_59, %c0_60] : memref<24x128xf32, #tpu.memory_space<vmem>>, vector<1x128xf32>
    tpu.vector_store %arg4[%c23_59, %c0_60], %953 {strides = array<i32>} : memref<24x128xf32, #tpu.memory_space<vmem>>, vector<1x128xf32>,
    return
  }
  func.func @transform_0(%arg0: i32) -> i32 {
    %c0_i32 = arith.constant 0 : i32
    %c0_i32_0 = arith.constant 0 : i32
    return %c0_i32 : i32
  }
  func.func @transform_1(%arg0: i32) -> (i32, i32) {
    %c0_i32 = arith.constant 0 : i32
    %c0_i32_0 = arith.constant 0 : i32
    return %c0_i32, %arg0 : i32, i32
  }
  func.func @transform_2(%arg0: i32) -> (i32, i32) {
    %c0_i32 = arith.constant 0 : i32
    %c0_i32_0 = arith.constant 0 : i32
    return %c0_i32, %arg0 : i32, i32
  }
  func.func @transform_3(%arg0: i32) -> (i32, i32) {
    %c0_i32 = arith.constant 0 : i32
    %c0_i32_0 = arith.constant 0 : i32
    return %c0_i32, %arg0 : i32, i32
  }
}

</mosaic_0001>

<bundles_post_ra>
// kernel: tpu_custom_call.1
= control target key start
LH: loop header
LB: loop body
LE: loop exit
PB: predicated region body
PF: predicated region fallthrough
CT: control target
= control target key end

     0   :  { %8 = vsyncpa [#allocation5], 0  ;;  %s2333_s0 = inlined_call_operand.hbm [shape: f32[96], index: 0, kind: input, shape index: {}]   ;;  %s2334_s1 = inlined_call_operand.hbm [shape: f32[24,128], index: 1, kind: input, shape index: {}]   ;;  %s2335_s2 = inlined_call_operand.hbm [shape: f32[3,128], index: 2, kind: input, shape index: {}]   ;;  %s2336_s3 = inlined_call_operand.hbm [shape: f32[24,128], index: 3, kind: output, shape index: {}]  }
   0x1   :  { %9 = vsyncpa [#allocation3], 0 }
   0x2   :  { %10 = vsyncpa [#allocation8], 0 }
   0x3   :  { %11 = vsyncpa [#allocation4], 0  ;;  %s17_s14 = sshll.u32 %s2333_s0, 4  ;;  %s25_s17 = sshll.u32 %s2334_s1, 4  ;;  %s18_s14 = int_to_ptr.hbm [resolvable:$true] %s17_s14  ;;  %s26_s17 = int_to_ptr.hbm [resolvable:$true] %s25_s17 }
   0x4   :  { %s1448_s18 = smov [#allocation2]   ;;  %s1449_s19 = smov [#allocation6]  }
   0x5   :  { %20 = dma.hbm_to_smem %s18_s14, 16, %s1448_s18, [#allocation5]  }
   0x6   :  { %s27_s20 = sshll.u32 %s1449_s19, 4  ;;  %s1450_s21 = smov 128   ;;  %s28_s20 = int_to_ptr.vmem [resolvable:$true] %s27_s20 }
   0x7   :  { %s1451_s22 = smov 8   ;;  %s39_s0 = sshll.u32 %s2335_s2, 4  ;;  %s40_s0 = int_to_ptr.hbm [resolvable:$true] %s39_s0 }
   0x8   :  { %33 = dma.hbm_to_vmem [thread:$0]  %s26_s17, 384, %s28_s20, [#allocation3], %s1450_s21, %s1450_s21, %s1451_s22  }
   0x9   :  { %s1452_s25 = smov [#allocation7]  }
   0xa   :  { %s41_s26 = sshll.u32 %s1452_s25, 4  ;;  %s42_s26 = int_to_ptr.vmem [resolvable:$true] %s41_s26 }
   0xb   :  { %44 = dma.hbm_to_vmem [thread:$0]  %s40_s0, 64, %s42_s26, [#allocation8]  }
   0xc   :  { %1440 = dma.done.wait [#allocation5], 16  }
   0xd   :  { %1441 = vsyncadd [#allocation5], 4294967280 }
   0xe   :  { %1442 = dma.done.wait [#allocation3], 384  }
   0xf   :  { %1443 = vsyncadd [#allocation3], 4294966912 }
  0x10   :  { %1444 = dma.done.wait [#allocation8], 64  }
  0x11   :  { %1445 = vsyncadd [#allocation8], 4294967232 }
  0x12   :  { %57 = sfence }
  0x13   :  { %s1278_s1 = sld [smem:[#allocation2 + $0x3]]  ;;  %v58_v0 = vld [vmem:[#allocation6] sm:$0xff]  ;;  %v59_v1 = vld [vmem:[#allocation6 + $0x8] sm:$0xff]  ;;  %v60_v2 = vld [vmem:[#allocation6 + $0x10] sm:$0xff]  ;;  %v1453_v40 = vmov 683565275  }
  0x14   :  { %s1279_s27 = sld [smem:[#allocation2 + $0x7]]  ;;  %v61_v3 = vmul.f32 %v58_v0, %v58_v0  ;;  %v62_v4 = vmul.f32 %v59_v1, %v59_v1  ;;  %v64_v5 = vmul.f32 %v60_v2, %v60_v2  ;;  %v1493_v6 = vld [vmem:[#allocation7] sm:$0x1]  ;;  %v1495_v8 = vld [vmem:[#allocation7 + $0x1] sm:$0x1] }
  0x15   :  { %s1280_s28 = sld [smem:[#allocation2 + $0xb]]  ;;  %v1499_v10 = vld [vmem:[#allocation7 + $0x2] sm:$0x1]  ;;  %v1454_v42 = vmov 2475754826  }
  0x16   :  { %v63_v7 = vadd.f32 %v62_v4, %v61_v3  ;;  %v1455_v44 = vmov 2131351028   ;;  %v1456_v46 = vmov 2102212464   ;;  %v1457_v48 = vmov 920167782  }
  0x17   :  { %v1458_v54 = vmov 1326507024   ;;  %s1559_s2 = sld [smem:[#allocation2]] }
  0x18   :  { %v65_v11 = vadd.f32 %v64_v5, %v63_v7  ;;  %s1567_s29 = sld [smem:[#allocation2 + $0x1]] }
  0x19   :  { %v1497_v9 = vstv %s1278_s1  ;;  %s1569_s30 = sld [smem:[#allocation2 + $0x2]] }
  0x1a   :  { %2348 = vst [vmem:[#allocation14_spill] sm:$0xff] %v1497_v9  ;;  %v485_v12 = vadd.f32 %v1497_v9, %v1493_v6  ;;  %v1503_v13 = vstv %s1279_s27  ;;  %v66_v16 = vadd.f32 1e-16, %v65_v11  ;;  %s1571_s4 = sld [smem:[#allocation2 + $0x4]] }
  0x1b   :  { %2349 = vst [vmem:[#allocation15_spill] sm:$0xff] %v1503_v13  ;;  %v488_v14 = vadd.f32 %v1503_v13, %v1495_v8  ;;  %v1507_v15 = vstv %s1280_s28  ;;  %s1576_s5 = sld [smem:[#allocation2 + $0x5]] }
  0x1c   :  { %2350 = vst [vmem:[#allocation16_spill] sm:$0xff] %v1507_v15  ;;  %v491_v17 = vadd.f32 %v1507_v15, %v1499_v10  ;;  %1351 = vrsqrt.f32 %v66_v16  ;;  %vm73_vm0 = vweird.f32 %v66_v16  ;;  %s1578_s6 = sld [smem:[#allocation2 + $0x6]] }
  0x1d   :  { %486 = vst [vmem:[#allocation9] sm:$0x1] %v485_v12  ;;  %s1580_s7 = sld [smem:[#allocation2 + $0x8]] }
  0x1e   :  { %489 = vst [vmem:[#allocation9 + $0x8] sm:$0x1] %v488_v14  ;;  %s1582_s8 = sld [smem:[#allocation2 + $0x9]] }
  0x1f   :  { %492 = vst [vmem:[#allocation9 + $0x10] sm:$0x1] %v491_v17  ;;  %s1584_s9 = sld [smem:[#allocation2 + $0xa]] }
  0x20   :  { %s1588_s10 = sld [smem:[#allocation2 + $0xf]] }
  0x21   :  { %s1590_s11 = sld [smem:[#allocation2 + $0x13]] }
  0x22   :  { %v1352_v18 = vpop.eup %1351  ;;  %s1592_s12 = sld [smem:[#allocation2 + $0x17]] }
  0x23   :  { %v68_v19 = vmul.f32 %v1352_v18, %v66_v16  ;;  %vm74_vm1 = vweird.f32 %v1352_v18  ;;  %s1594_s13 = sld [smem:[#allocation2 + $0xc]] }
  0x24   :  { %vm75_vm2 = vmor %vm73_vm0, %vm74_vm1  ;;  %s1596_s14 = sld [smem:[#allocation2 + $0xd]] }
  0x25   :  { %v69_v20 = vmul.f32 %v1352_v18, %v68_v19  ;;  %s1598_s15 = sld [smem:[#allocation2 + $0xe]] }
  0x26   :  { %s1600_s16 = sld [smem:[#allocation2 + $0x10]] }
  0x27   :  { %v70_v21 = vmul.f32 0.5, %v69_v20  ;;  %s1602_s17 = sld [smem:[#allocation2 + $0x11]] }
  0x28   :  { %s1604_s18 = sld [smem:[#allocation2 + $0x12]] }
  0x29   :  { %v71_v22 = vsub.f32 1.5, %v70_v21  ;;  %s1607_s19 = sld [smem:[#allocation2 + $0x14]] }
  0x2a   :  { %s1610_s20 = sld [smem:[#allocation2 + $0x15]] }
  0x2b   :  { %v72_v23 = vmul.f32 %v1352_v18, %v71_v22  ;;  %s1613_s23 = sld [smem:[#allocation2 + $0x16]] }
  0x2c   :  { %s1848_s24 = sld [smem:[#allocation2 + $0x1b]] }
  0x2d   :  { %v76_v24 = vsel %vm75_vm2, %v1352_v18, %v72_v23  ;;  %s1856_s0 = sld [smem:[#allocation2 + $0x1f]] }
  0x2e   :  { %v1511_v25 = vmul.f32 %v76_v24, %v66_v16  ;;  %v1513_v26 = vmul.f32 %v76_v24, %v58_v0  ;;  %v1515_v27 = vmul.f32 %v76_v24, %v59_v1  ;;  %v1517_v28 = vmul.f32 %v76_v24, %v60_v2  ;;  %s1862_s25 = sld [smem:[#allocation2 + $0x23]] }
  0x2f   :  { %s1898_s26 = sld [smem:[#allocation2 + $0x18]] }
  0x30   :  { %v84_v29 = vand.u32 2139095040, %v1511_v25  ;;  %v81_v31 = vand.u32 2147483647, %v1511_v25  ;;  %vm83_vm15 = vcmp.lt.s32.totalorder %v1511_v25, 0  ;;  %s1906_s1 = sld [smem:[#allocation2 + $0x19]] }
  0x31   :  { %s1912_s27 = sld [smem:[#allocation2 + $0x1a]] }
  0x32   :  { %v85_v30 = vshrl.u32 %v84_v29, 23  ;;  %v88_v34 = vand.u32 8388607, %v81_v31  ;;  %vm1563_vm0 = vcmp.le.f32.partialorder %v81_v31, 0.7853982  ;;  %s1931_s28 = sld [smem:[#allocation2 + $0x1c]] }
  0x34   :  { %v1264_v32 = vadd.s32 4294967169, %v85_v30  ;;  %v89_v37 = vor.u32 8388608, %v88_v34 }
  0x36   :  { %v91_v33 = vadd.s32 1, %v1264_v32  ;;  %v1526_v56 = vshll.u32 %v89_v37, 8 }
  0x38   :  { %vm92_vm3 = vcmp.gt.s32.totalorder %v91_v33, 0  ;;  %v130_v4 = vand.u32 65535, %v1526_v56  ;;  %v131_v5 = vshrl.u32 %v1526_v56, 16 }
  0x39   :  { %v93_v35 = vsel %vm92_vm3, %v91_v33, 0  ;;  %vm224_vm3 = vweird.f32 %v1511_v25 }
  0x3a   :  { %v95_v36 = vand.u32 31, %v93_v35  ;;  %v1523_v38 = vshrl.u32 %v93_v35, 5 }
  0x3c   :  { %v96_v39 = vsub.s32 32, %v95_v36  ;;  %v98_v41 = vshll.u32 %v1453_v40, %v95_v36  ;;  %v101_v43 = vshll.u32 %v1454_v42, %v95_v36  ;;  %v104_v45 = vshll.u32 %v1455_v44, %v95_v36 }
  0x3d   :  { %v107_v47 = vshll.u32 %v1456_v46, %v95_v36  ;;  %v110_v49 = vshll.u32 %v1457_v48, %v95_v36  ;;  %vm113_vm4 = vcmp.lt.s32.totalorder %v1523_v38, 1  ;;  %vm116_vm5 = vcmp.lt.s32.totalorder %v1523_v38, 4 }
  0x3e   :  { %v99_v50 = vshrl.u32 %v1454_v42, %v96_v39  ;;  %v102_v51 = vshrl.u32 %v1455_v44, %v96_v39  ;;  %v105_v52 = vshrl.u32 %v1456_v46, %v96_v39  ;;  %v108_v53 = vshrl.u32 %v1457_v48, %v96_v39 }
  0x3f   :  { %v111_v55 = vshrl.u32 %v1458_v54, %v96_v39  ;;  %vm115_vm6 = vcmp.lt.s32.totalorder %v1523_v38, 3  ;;  %vm114_vm7 = vcmp.lt.s32.totalorder %v1523_v38, 2  ;;  %v97_v18 = vshrl.u32 %v1453_v40, %v96_v39 }
  0x40   :  { %v100_v57 = vor.u32 %v99_v50, %v98_v41  ;;  %v103_v58 = vor.u32 %v102_v51, %v101_v43  ;;  %v106_v59 = vor.u32 %v105_v52, %v104_v45  ;;  %v109_v60 = vor.u32 %v108_v53, %v107_v47 }
  0x41   :  { %v112_v61 = vor.u32 %v111_v55, %v110_v49  ;;  %v1459_v40 = vmov 0  }
  0x42   :  { %v121_v62 = vsel %vm113_vm4, %v100_v57, %v103_v58  ;;  %v125_v63 = vsel %vm113_vm4, %v103_v58, %v106_v59  ;;  %v122_v0 = vsel %vm116_vm5, %v109_v60, 920167782  ;;  %v117_v36 = vsel %vm113_vm4, %v97_v18, %v100_v57 }
  0x43   :  { %v126_v1 = vsel %vm116_vm5, %v112_v61, 1326507024  ;;  %v123_v2 = vsel %vm115_vm6, %v106_v59, %v122_v0  ;;  %v118_v39 = vsel %vm116_vm5, %v106_v59, 2102212464 }
  0x44   :  { %v127_v3 = vsel %vm115_vm6, %v109_v60, %v126_v1  ;;  %v124_v7 = vsel %vm114_vm7, %v121_v62, %v123_v2  ;;  %v119_v49 = vsel %vm115_vm6, %v103_v58, %v118_v39 }
  0x45   :  { %v128_v11 = vsel %vm114_vm7, %v125_v63, %v127_v3  ;;  %v154_v16 = vand.u32 65535, %v124_v7  ;;  %v155_v17 = vshrl.u32 %v124_v7, 16  ;;  %v120_v59 = vsel %vm114_vm7, %v117_v36, %v119_v49 }
  0x46   :  { %v132_v12 = vand.u32 65535, %v128_v11  ;;  %v133_v14 = vshrl.u32 %v128_v11, 16  ;;  %v174_v63 = vmul.u32 %v1526_v56, %v120_v59  ;;  %v430_v59 = vstv %s1559_s2  ;;  %s1939_s2 = sld [smem:[#allocation2 + $0x1d]] }
  0x47   :  { %v156_v22 = vmul.u32 %v154_v16, %v130_v4  ;;  %v157_v23 = vmul.u32 %v155_v17, %v130_v4  ;;  %v158_v24 = vmul.u32 %v154_v16, %v131_v5  ;;  %v159_v33 = vmul.u32 %v155_v17, %v131_v5 }
  0x48   :  { %v134_v19 = vmul.u32 %v132_v12, %v130_v4  ;;  %v135_v20 = vmul.u32 %v133_v14, %v130_v4  ;;  %v136_v21 = vmul.u32 %v132_v12, %v131_v5  ;;  %v137_v29 = vmul.u32 %v133_v14, %v131_v5 }
  0x49   :  { %v160_v34 = vshll.u32 %v157_v23, 16  ;;  %v162_v35 = vshll.u32 %v158_v24, 16  ;;  %v161_v47 = vshrl.u32 %v157_v23, 16  ;;  %v163_v53 = vshrl.u32 %v158_v24, 16 }
  0x4a   :  { %v138_v30 = vshll.u32 %v135_v20, 16  ;;  %v140_v32 = vshll.u32 %v136_v21, 16  ;;  %v139_v43 = vshrl.u32 %v135_v20, 16  ;;  %v141_v50 = vshrl.u32 %v136_v21, 16 }
  0x4b   :  { %vm164_vm9 = vc.u32 %v156_v22, %v160_v34  ;;  %v166_v42 = vadd.s32 %v160_v34, %v156_v22 }
  0x4c   :  { %vm142_vm8 = vc.u32 %v134_v19, %v138_v30  ;;  %v144_v37 = vadd.s32 %v138_v30, %v134_v19  ;;  %v165_v45 = vsel %vm164_vm9, 1, %v1459_v40 }
  0x4d   :  { %v143_v41 = vsel %vm142_vm8, 1, %v1459_v40  ;;  %v167_v48 = vadd.s32 %v165_v45, %v159_v33  ;;  %vm168_vm11 = vc.u32 %v166_v42, %v162_v35  ;;  %v170_v57 = vadd.s32 %v166_v42, %v162_v35 }
  0x4e   :  { %v145_v44 = vadd.s32 %v143_v41, %v137_v29  ;;  %vm146_vm10 = vc.u32 %v144_v37, %v140_v32  ;;  %v169_v52 = vsel %vm168_vm11, 1, %v1459_v40 }
  0x4f   :  { %v147_v46 = vsel %vm146_vm10, 1, %v1459_v40  ;;  %v171_v54 = vadd.s32 %v169_v52, %v167_v48 }
  0x50   :  { %v149_v51 = vadd.s32 %v147_v46, %v145_v44 }
  0x51   :  { %v172_v60 = vadd.s32 %v171_v54, %v161_v47 }
  0x52   :  { %v150_v55 = vadd.s32 %v149_v51, %v139_v43 }
  0x53   :  { %v173_v62 = vadd.s32 %v172_v60, %v163_v53 }
  0x54   :  { %v151_v61 = vadd.s32 %v150_v55, %v141_v50 }
  0x55   :  { %v177_v0 = vadd.s32 1, %v173_v62 }
  0x56   :  { %vm176_vm12 = vc.u32 %v151_v61, %v170_v57  ;;  %v175_v38 = vadd.s32 %v170_v57, %v151_v61 }
  0x57   :  { %v178_v1 = vsel %vm176_vm12, %v177_v0, %v173_v62  ;;  %v1616_v0 = vstv %s1569_s30  ;;  %s1953_s30 = sld [smem:[#allocation2 + $0x20]] }
  0x58   :  { %v179_v2 = vadd.s32 %v178_v1, %v174_v63  ;;  %v432_v63 = vstv %s1567_s29  ;;  %v1619_v1 = vstv %s1571_s4  ;;  %s1942_s29 = sld [smem:[#allocation2 + $0x1e]] }
  0x59   :  { %s1959_s4 = sld [smem:[#allocation2 + $0x21]] }
  0x5a   :  { %v180_v58 = vadd.s32 536870912, %v179_v2 }
  0x5c   :  { %v181_v3 = vshrl.u32 %v180_v58, 30  ;;  %v1625_v58 = vstv %s1580_s7  ;;  %s2003_s7 = sld [smem:[#allocation2 + $0x2b]] }
  0x5e   :  { %v182_v4 = vshll.u32 %v181_v3, 30  ;;  %v205_v34 = vsub.s32 4, %v181_v3 }
  0x60   :  { %v183_v5 = vsub.s32 %v179_v2, %v182_v4  ;;  %v206_v31 = vsel %vm83_vm15, %v205_v34, %v181_v3  ;;  %v1622_v2 = vstv %s1576_s5  ;;  %s1970_s5 = sld [smem:[#allocation2 + $0x22]] }
  0x61   :  { %v208_v41 = vsel %vm1563_vm0, 0, %v206_v31  ;;  %v1682_v31 = vstv %s1613_s23  ;;  %s2138_s23 = sld [smem:[#allocation2 + $0x3f]] }
  0x62   :  { %vm184_vm13 = vcmp.lt.s32.totalorder %v183_v5, 0  ;;  %v185_v7 = vsub.s32 0, %v183_v5  ;;  %v379_v44 = vadd.s32 3, %v208_v41  ;;  %v225_v49 = vand.u32 3, %v208_v41 }
  0x64   :  { %v186_v11 = vsel %vm184_vm13, %v185_v7, %v183_v5  ;;  %v380_v50 = vand.u32 3, %v379_v44  ;;  %vm230_vm1 = vcmp.eq.s32.totalorder %v225_v49, 2  ;;  %vm226_vm4 = vcmp.lt.s32.totalorder %v225_v49, 2 }
  0x65   :  { %v187_v12 = vclz %v186_v11  ;;  %vm227_vm5 = vcmp.eq.s32.totalorder %v225_v49, 0  ;;  %v1631_v7 = vstv %s1578_s6  ;;  %s1998_s6 = sld [smem:[#allocation2 + $0x27]] }
  0x66   :  { %vm385_vm2 = vcmp.eq.s32.totalorder %v380_v50, 2  ;;  %vm381_vm6 = vcmp.lt.s32.totalorder %v380_v50, 2  ;;  %vm382_vm7 = vcmp.eq.s32.totalorder %v380_v50, 0 }
  0x67   :  { %v1265_v14 = vadd.s32 4294967294, %v187_v12 }
  0x69   :  { %vm1266_vm14 = vcmp.lt.s32.totalorder %v1265_v14, 0 }
  0x6a   :  { %v190_v16 = vsel %vm1266_vm14, 0, %v1265_v14  ;;  %v1636_v14 = vstv %s1590_s11  ;;  %s2043_s11 = sld [smem:[#allocation2 + $0x3b]] }
  0x6b   :  { %v191_v17 = vsub.s32 32, %v190_v16  ;;  %v192_v18 = vshll.u32 %v183_v5, %v190_v16  ;;  %v195_v19 = vsub.s32 4294967266, %v190_v16  ;;  %v1628_v5 = vstv %s1588_s10  ;;  %s2037_s10 = sld [smem:[#allocation2 + $0x37]] }
  0x6d   :  { %v193_v56 = vshrl.u32 %v175_v38, %v191_v17  ;;  %v196_v20 = vadd.s32 127, %v195_v19  ;;  %v1639_v38 = vstv %s1582_s8  ;;  %v1649_v19 = vstv %s1594_s13  ;;  %s2006_s8 = sld [smem:[#allocation2 + $0x2f]] }
  0x6e   :  { %s2055_s13 = sld [smem:[#allocation2 + $0x31]] }
  0x6f   :  { %v194_v21 = vor.u32 %v193_v56, %v192_v18  ;;  %v197_v22 = vshll.u32 %v196_v20, 23  ;;  %v1646_v18 = vstv %s1592_s12  ;;  %v1652_v20 = vstv %s1584_s9  ;;  %s2032_s9 = sld [smem:[#allocation2 + $0x33]] }
  0x70   :  { %s2050_s12 = sld [smem:[#allocation2 + $0x30]] }
  0x71   :  { %v198_v23 = vor.u32 4788187, %v197_v22  ;;  %v201_v24 = vcvt.s32.f32 %v194_v21  ;;  %v1655_v21 = vstv %s1596_s14  ;;  %v1658_v22 = vstv %s1598_s15  ;;  %s2058_s14 = sld [smem:[#allocation2 + $0x32]] }
  0x72   :  { %s2072_s15 = sld [smem:[#allocation2 + $0x34]] }
  0x73   :  { %v199_v29 = vand.u32 2147483647, %v198_v23 }
  0x75   :  { %v202_v30 = vmul.f32 %v201_v24, %v199_v29  ;;  %v1662_v24 = vstv %s1600_s16  ;;  %v1668_v29 = vstv %s1604_s18  ;;  %s2077_s16 = sld [smem:[#allocation2 + $0x35]] }
  0x76   :  { %s2088_s18 = sld [smem:[#allocation2 + $0x38]] }
  0x77   :  { %v203_v33 = vxor.u32 2147483648, %v202_v30 }
  0x79   :  { %v204_v35 = vsel %vm83_vm15, %v203_v33, %v202_v30 }
  0x7a   :  { %v207_v36 = vsel %vm1563_vm0, %v1511_v25, %v204_v35  ;;  %v1665_v25 = vstv %s1602_s17  ;;  %s2084_s17 = sld [smem:[#allocation2 + $0x36]] }
  0x7b   :  { %v209_v37 = vmul.f32 %v207_v36, %v207_v36 }
  0x7d   :  { %v210_v39 = vmul.f32 -0.001358992, %v209_v37  ;;  %v217_v40 = vmul.f32 -0.00019511016, %v209_v37 }
  0x7f   :  { %v211_v42 = vadd.f32 0.041655596, %v210_v39  ;;  %v218_v43 = vadd.f32 0.008332121, %v217_v40 }
  0x81   :  { %v212_v45 = vmul.f32 %v211_v42, %v209_v37  ;;  %v219_v46 = vmul.f32 %v218_v43, %v209_v37 }
  0x83   :  { %v213_v47 = vadd.f32 -0.4999988, %v212_v45  ;;  %v220_v48 = vadd.f32 -0.16666654, %v219_v46 }
  0x85   :  { %v214_v51 = vmul.f32 %v213_v47, %v209_v37  ;;  %v221_v52 = vmul.f32 %v220_v48, %v209_v37  ;;  %v1679_v37 = vstv %s1610_s20  ;;  %s2105_s20 = sld [smem:[#allocation2 + $0x3a]] }
  0x87   :  { %v215_v53 = vadd.f32 1.0, %v214_v51  ;;  %v222_v54 = vadd.f32 1.0, %v221_v52 }
  0x89   :  { %v223_v55 = vmul.f32 %v222_v54, %v207_v36  ;;  %v231_v57 = vxor.u32 2147483648, %v215_v53  ;;  %v1676_v36 = vstv %s1607_s19  ;;  %s2099_s19 = sld [smem:[#allocation2 + $0x39]] }
  0x8b   :  { %v228_v60 = vxor.u32 2147483648, %v223_v55  ;;  %v232_v61 = vsel %vm230_vm1, %v231_v57, %v223_v55  ;;  %v387_v62 = vsel %vm385_vm2, %v231_v57, %v223_v55 }
  0x8d   :  { %v229_v3 = vsel %vm227_vm5, %v215_v53, %v228_v60  ;;  %v384_v4 = vsel %vm382_vm7, %v215_v53, %v228_v60 }
  0x8e   :  { %v233_v11 = vsel %vm226_vm4, %v229_v3, %v232_v61  ;;  %v388_v12 = vsel %vm381_vm6, %v384_v4, %v387_v62 }
  0x8f   :  { %v234_v16 = vsel %vm224_vm3, nan, %v233_v11  ;;  %v389_v17 = vsel %vm224_vm3, nan, %v388_v12 }
  0x90   :  { %v390_v56 = vsub.f32 1.0, %v234_v16  ;;  %v395_v23 = vmul.f32 %v389_v17, %v1517_v28  ;;  %v398_v32 = vmul.f32 %v389_v17, %v1515_v27  ;;  %v406_v35 = vmul.f32 %v389_v17, %v1513_v26 }
  0x92   :  { %v391_v30 = vmul.f32 %v390_v56, %v1513_v26  ;;  %v400_v33 = vmul.f32 %v390_v56, %v1515_v27  ;;  %v408_v34 = vmul.f32 %v390_v56, %v1517_v28 }
  0x94   :  { %v392_v39 = vmul.f32 %v391_v30, %v1513_v26  ;;  %v394_v40 = vmul.f32 %v391_v30, %v1515_v27  ;;  %v397_v41 = vmul.f32 %v391_v30, %v1517_v28  ;;  %v401_v42 = vmul.f32 %v400_v33, %v1513_v26 }
  0x95   :  { %v403_v43 = vmul.f32 %v400_v33, %v1515_v27  ;;  %v405_v44 = vmul.f32 %v400_v33, %v1517_v28  ;;  %v409_v45 = vmul.f32 %v408_v34, %v1513_v26  ;;  %v411_v46 = vmul.f32 %v408_v34, %v1515_v27 }
  0x96   :  { %v1692_v47 = vadd.f32 %v392_v39, %v234_v16  ;;  %v1694_v48 = vsub.f32 %v394_v40, %v395_v23  ;;  %v1696_v49 = vadd.f32 %v398_v32, %v397_v41  ;;  %v1698_v50 = vadd.f32 %v401_v42, %v395_v23 }
  0x97   :  { %v1700_v51 = vadd.f32 %v403_v43, %v234_v16  ;;  %v1702_v52 = vsub.f32 %v405_v44, %v406_v35  ;;  %v1704_v53 = vsub.f32 %v409_v45, %v398_v32  ;;  %v1706_v54 = vadd.f32 %v411_v46, %v406_v35 }
  0x98   :  { %v413_v26 = vmul.f32 %v408_v34, %v1517_v28  ;;  %v431_v27 = vmul.f32 %v430_v59, %v1692_v47  ;;  %v433_v55 = vmul.f32 %v432_v63, %v1698_v50  ;;  %v438_v57 = vmul.f32 %v430_v59, %v1694_v48 }
  0x99   :  { %v436_v60 = vmul.f32 %v1616_v0, %v1704_v53  ;;  %v439_v61 = vmul.f32 %v432_v63, %v1700_v51  ;;  %v441_v62 = vmul.f32 %v1616_v0, %v1706_v54  ;;  %v443_v3 = vmul.f32 %v430_v59, %v1696_v49 }
  0x9a   :  { %v1718_v4 = vadd.f32 %v413_v26, %v234_v16  ;;  %v434_v11 = vadd.f32 %v433_v55, %v431_v27  ;;  %v444_v28 = vmul.f32 %v432_v63, %v1702_v52  ;;  %v449_v12 = vmul.f32 %v1619_v1, %v1692_v47 }
  0x9b   :  { %v440_v17 = vadd.f32 %v439_v61, %v438_v57  ;;  %v451_v56 = vmul.f32 %v1622_v2, %v1698_v50  ;;  %v454_v23 = vmul.f32 %v1631_v7, %v1704_v53  ;;  %v456_v30 = vmul.f32 %v1619_v1, %v1694_v48 }
  0x9c   :  { %v1729_v32 = vadd.f32 %v436_v60, %v434_v11  ;;  %v445_v59 = vadd.f32 %v444_v28, %v443_v3  ;;  %v446_v16 = vmul.f32 %v1616_v0, %v1718_v4  ;;  %v457_v63 = vmul.f32 %v1622_v2, %v1700_v51 }
  0x9d   :  { %v1735_v33 = vadd.f32 %v441_v62, %v440_v17  ;;  %v452_v34 = vadd.f32 %v451_v56, %v449_v12  ;;  %v459_v35 = vmul.f32 %v1631_v7, %v1706_v54  ;;  %v461_v39 = vmul.f32 %v1619_v1, %v1696_v49 }
  0x9e   :  { %v1741_v40 = vadd.f32 %v446_v16, %v445_v59  ;;  %v506_v41 = vmul.f32 %v1628_v5, %v1729_v32  ;;  %v458_v42 = vadd.f32 %v457_v63, %v456_v30  ;;  %v462_v0 = vmul.f32 %v1622_v2, %v1702_v52 }
  0x9f   :  { %v508_v43 = vmul.f32 %v1636_v14, %v1735_v33  ;;  %v1749_v44 = vadd.f32 %v454_v23, %v452_v34  ;;  %v464_v45 = vmul.f32 %v1631_v7, %v1718_v4  ;;  %v467_v1 = vmul.f32 %v1625_v58, %v1692_v47 }
  0xa0   :  { %v511_v46 = vmul.f32 %v1646_v18, %v1741_v40  ;;  %v1757_v26 = vadd.f32 %v459_v35, %v458_v42  ;;  %v463_v27 = vadd.f32 %v462_v0, %v461_v39  ;;  %v469_v2 = vmul.f32 %v1639_v38, %v1698_v50 }
  0xa1   :  { %v509_v55 = vadd.f32 %v508_v43, %v506_v41  ;;  %v514_v57 = vmul.f32 %v1628_v5, %v1749_v44  ;;  %v472_v60 = vmul.f32 %v1652_v20, %v1704_v53  ;;  %v474_v7 = vmul.f32 %v1625_v58, %v1694_v48 }
  0xa2   :  { %v1767_v61 = vadd.f32 %v464_v45, %v463_v27  ;;  %v515_v62 = vmul.f32 %v1636_v14, %v1757_v26  ;;  %v470_v3 = vadd.f32 %v469_v2, %v467_v1  ;;  %v475_v11 = vmul.f32 %v1639_v38, %v1700_v51 }
  0xa3   :  { %v512_v28 = vadd.f32 %v511_v46, %v509_v55  ;;  %v477_v12 = vmul.f32 %v1652_v20, %v1706_v54  ;;  %v479_v17 = vmul.f32 %v1625_v58, %v1696_v49  ;;  %v480_v56 = vmul.f32 %v1639_v38, %v1702_v52 }
  0xa4   :  { %2353 = vst [vmem:[#allocation17_spill] sm:$0xff] %v1767_v61  ;;  %v516_v23 = vadd.f32 %v515_v62, %v514_v57  ;;  %v517_v30 = vmul.f32 %v1646_v18, %v1767_v61  ;;  %v1781_v59 = vadd.f32 %v472_v60, %v470_v3  ;;  %v476_v16 = vadd.f32 %v475_v11, %v474_v7 }
  0xa5   :  { %v1784_v63 = vadd.f32 %v512_v28, %v1497_v9  ;;  %v481_v34 = vadd.f32 %v480_v56, %v479_v17  ;;  %v482_v35 = vmul.f32 %v1652_v20, %v1718_v4  ;;  %v527_v58 = vmul.f32 %v1649_v19, %v1692_v47 }
  0xa6   :  { %2354 = vst [vmem:[#allocation18_spill] sm:$0xff] %v1781_v59  ;;  %v518_v39 = vadd.f32 %v517_v30, %v516_v23  ;;  %v1790_v41 = vadd.f32 %v477_v12, %v476_v16  ;;  %v520_v38 = vmul.f32 %v1628_v5, %v1781_v59  ;;  %v529_v42 = vmul.f32 %v1655_v21, %v1698_v50 }
  0xa7   :  { %v652_v0 = vadd.f32 %v1784_v63, %v1493_v6  ;;  %v1798_v43 = vadd.f32 %v482_v35, %v481_v34  ;;  %v532_v20 = vmul.f32 %v1658_v22, %v1704_v53  ;;  %v534_v45 = vmul.f32 %v1649_v19, %v1694_v48 }
  0xa8   :  { %2355 = vst [vmem:[#allocation19_spill] sm:$0xff] %v1790_v41  ;;  %v1805_v1 = vadd.f32 %v518_v39, %v1503_v13  ;;  %v521_v5 = vmul.f32 %v1636_v14, %v1790_v41  ;;  %v530_v46 = vadd.f32 %v529_v42, %v527_v58  ;;  %v535_v27 = vmul.f32 %v1655_v21, %v1700_v51 }
  0xa9   :  { %2356 = vst [vmem:[#allocation20_spill] sm:$0xff] %v1798_v43  ;;  %v523_v2 = vmul.f32 %v1646_v18, %v1798_v43  ;;  %v537_v55 = vmul.f32 %v1658_v22, %v1706_v54  ;;  %v539_v57 = vmul.f32 %v1649_v19, %v1696_v49  ;;  %v540_v60 = vmul.f32 %v1655_v21, %v1702_v52 }
  0xaa   :  { %653 = vst [vmem:[#allocation9 + $0x1] sm:$0x1] %v652_v0  ;;  %v654_v14 = vadd.f32 %v1805_v1, %v1495_v8  ;;  %v522_v7 = vadd.f32 %v521_v5, %v520_v38  ;;  %v533_v62 = vadd.f32 %v532_v20, %v530_v46  ;;  %v536_v3 = vadd.f32 %v535_v27, %v534_v45 }
  0xab   :  { %v541_v11 = vadd.f32 %v540_v60, %v539_v57  ;;  %v542_v28 = vmul.f32 %v1658_v22, %v1718_v4  ;;  %v545_v18 = vmul.f32 %v1662_v24, %v1692_v47  ;;  %v547_v12 = vmul.f32 %v1665_v25, %v1698_v50 }
  0xac   :  { %655 = vst [vmem:[#allocation9 + $0x9] sm:$0x1] %v654_v14  ;;  %v524_v19 = vadd.f32 %v523_v2, %v522_v7  ;;  %v538_v17 = vadd.f32 %v537_v55, %v536_v3  ;;  %v550_v21 = vmul.f32 %v1668_v29, %v1704_v53  ;;  %v552_v56 = vmul.f32 %v1662_v24, %v1694_v48 }
  0xad   :  { %v543_v23 = vadd.f32 %v542_v28, %v541_v11  ;;  %v548_v30 = vadd.f32 %v547_v12, %v545_v18  ;;  %v553_v22 = vmul.f32 %v1665_v25, %v1700_v51  ;;  %v555_v16 = vmul.f32 %v1668_v29, %v1706_v54 }
  0xae   :  { %v1836_v34 = vadd.f32 %v524_v19, %v1507_v15  ;;  %v557_v35 = vmul.f32 %v1662_v24, %v1696_v49  ;;  %v558_v58 = vmul.f32 %v1665_v25, %v1702_v52  ;;  %v560_v39 = vmul.f32 %v1668_v29, %v1718_v4 }
  0xaf   :  { %v551_v38 = vadd.f32 %v550_v21, %v548_v30  ;;  %v554_v42 = vadd.f32 %v553_v22, %v552_v56  ;;  %v563_v0 = vmul.f32 %v1676_v36, %v1692_v47  ;;  %v565_v20 = vmul.f32 %v1679_v37, %v1698_v50 }
  0xb0   :  { %v656_v45 = vadd.f32 %v1836_v34, %v1499_v10  ;;  %v559_v24 = vadd.f32 %v558_v58, %v557_v35  ;;  %v568_v25 = vmul.f32 %v1682_v31, %v1704_v53  ;;  %v570_v29 = vmul.f32 %v1676_v36, %v1694_v48 }
  0xb1   :  { %v556_v5 = vadd.f32 %v555_v16, %v554_v42  ;;  %v566_v46 = vadd.f32 %v565_v20, %v563_v0  ;;  %v571_v27 = vmul.f32 %v1679_v37, %v1700_v51  ;;  %v573_v2 = vmul.f32 %v1682_v31, %v1706_v54 }
  0xb2   :  { %657 = vst [vmem:[#allocation9 + $0x11] sm:$0x1] %v656_v45  ;;  %v561_v55 = vadd.f32 %v560_v39, %v559_v24  ;;  %v575_v57 = vmul.f32 %v1676_v36, %v1696_v49  ;;  %v576_v60 = vmul.f32 %v1679_v37, %v1702_v52  ;;  %v578_v14 = vmul.f32 %v1682_v31, %v1718_v4 }
  0xb3   :  { %v569_v7 = vadd.f32 %v568_v25, %v566_v46  ;;  %v572_v3 = vadd.f32 %v571_v27, %v570_v29  ;;  %v581_v11 = vrot.slane %v533_v62, 1  ;;  %v585_v28 = vrot.slane %v551_v38, 1 }
  0xb4   :  { %v577_v18 = vadd.f32 %v576_v60, %v575_v57  ;;  %v595_v12 = vrot.slane %v538_v17, 1  ;;  %v599_v19 = vrot.slane %v556_v5, 1  ;;  %v609_v21 = vrot.slane %v543_v23, 1 }
  0xb5   :  { %v574_v56 = vadd.f32 %v573_v2, %v572_v3  ;;  %v583_v30 = vmul.f32 %v581_v11, %v1729_v32  ;;  %v587_v36 = vmul.f32 %v585_v28, %v1735_v33  ;;  %v590_v22 = vrot.slane %v569_v7, 1 }
  0xb6   :  { %v579_v37 = vadd.f32 %v578_v14, %v577_v18  ;;  %v597_v31 = vmul.f32 %v595_v12, %v1729_v32  ;;  %v601_v16 = vmul.f32 %v599_v19, %v1735_v33  ;;  %v611_v62 = vmul.f32 %v609_v21, %v1729_v32 }
  0xb7   :  { %v588_v35 = vadd.f32 %v587_v36, %v583_v30  ;;  %v592_v17 = vmul.f32 %v590_v22, %v1741_v40  ;;  %v604_v58 = vrot.slane %v574_v56, 1  ;;  %v613_v23 = vrot.slane %v561_v55, 1 }
  0xb8   :  { %v602_v39 = vadd.f32 %v601_v16, %v597_v31  ;;  %v618_v38 = vrot.slane %v579_v37, 1  ;;  %v670_v42 = vstv %s1848_s24  ;;  %v1878_v0 = vstv %s1856_s0  ;;  %s2142_s24 = sld [smem:[#allocation2 + $0x43]] }
  0xb9   :  { %v1880_v20 = vadd.f32 %v592_v17, %v588_v35  ;;  %v606_v45 = vmul.f32 %v604_v58, %v1741_v40  ;;  %v615_v24 = vmul.f32 %v613_v23, %v1735_v33  ;;  %v1885_v25 = vstv %s1862_s25  ;;  %s2148_s0 = sld [smem:[#allocation2 + $0x47]] }
  0xba   :  { %v620_v29 = vmul.f32 %v618_v38, %v1741_v40  ;;  %v622_v5 = vmul.f32 %v581_v11, %v1749_v44  ;;  %v623_v46 = vmul.f32 %v585_v28, %v1757_v26  ;;  %v625_v27 = vmul.f32 %v590_v22, %v1767_v61  ;;  %s2175_s25 = sld [smem:[#allocation2 + $0x4b]] }
  0xbb   :  { %v1891_v2 = vadd.f32 %v606_v45, %v602_v39  ;;  %v616_v55 = vadd.f32 %v615_v24, %v611_v62  ;;  %v671_v57 = vmul.f32 %v670_v42, %v1880_v20  ;;  %v627_v60 = vmul.f32 %v595_v12, %v1749_v44 }
  0xbc   :  { %v624_v14 = vadd.f32 %v623_v46, %v622_v5  ;;  %v628_v7 = vmul.f32 %v599_v19, %v1757_v26  ;;  %v630_v3 = vmul.f32 %v604_v58, %v1767_v61  ;;  %v632_v18 = vmul.f32 %v609_v21, %v1749_v44 }
  0xbd   :  { %v1900_v56 = vadd.f32 %v620_v29, %v616_v55  ;;  %v673_v30 = vmul.f32 %v1878_v0, %v1891_v2  ;;  %v633_v36 = vmul.f32 %v613_v23, %v1757_v26  ;;  %v635_v37 = vmul.f32 %v618_v38, %v1767_v61 }
  0xbe   :  { %v1908_v31 = vadd.f32 %v625_v27, %v624_v14  ;;  %v629_v16 = vadd.f32 %v628_v7, %v627_v60  ;;  %v637_v62 = vmul.f32 %v581_v11, %v1781_v59  ;;  %v638_v35 = vmul.f32 %v585_v28, %v1790_v41 }
  0xbf   :  { %v674_v17 = vadd.f32 %v673_v30, %v671_v57  ;;  %v676_v39 = vmul.f32 %v1885_v25, %v1900_v56  ;;  %v634_v45 = vadd.f32 %v633_v36, %v632_v18  ;;  %v640_v24 = vmul.f32 %v590_v22, %v1798_v43 }
  0xc0   :  { %v1917_v29 = vadd.f32 %v630_v3, %v629_v16  ;;  %v679_v5 = vmul.f32 %v670_v42, %v1908_v31  ;;  %v639_v46 = vadd.f32 %v638_v35, %v637_v62  ;;  %v642_v27 = vmul.f32 %v595_v12, %v1781_v59 }
  0xc1   :  { %v677_v55 = vadd.f32 %v676_v39, %v674_v17  ;;  %v1921_v11 = vadd.f32 %v635_v37, %v634_v45  ;;  %v643_v28 = vmul.f32 %v599_v19, %v1790_v41  ;;  %v645_v57 = vmul.f32 %v604_v58, %v1798_v43 }
  0xc2   :  { %v680_v60 = vmul.f32 %v1878_v0, %v1917_v29  ;;  %v1927_v14 = vadd.f32 %v640_v24, %v639_v46  ;;  %v647_v22 = vmul.f32 %v609_v21, %v1781_v59  ;;  %v648_v7 = vmul.f32 %v613_v23, %v1790_v41 }
  0xc3   :  { %v1934_v12 = vadd.f32 %v677_v55, %v1784_v63  ;;  %v682_v19 = vmul.f32 %v1885_v25, %v1921_v11  ;;  %v644_v3 = vadd.f32 %v643_v28, %v642_v27  ;;  %v650_v58 = vmul.f32 %v618_v38, %v1798_v43 }
  0xc4   :  { %v681_v18 = vadd.f32 %v680_v60, %v679_v5  ;;  %v649_v30 = vadd.f32 %v648_v7, %v647_v22  ;;  %v685_v21 = vmul.f32 %v670_v42, %v1927_v14  ;;  %v691_v23 = vstv %s1898_s26  ;;  %s2179_s26 = sld [smem:[#allocation2 + $0x4f]] }
  0xc5   :  { %v817_v36 = vadd.f32 %v1934_v12, %v1493_v6  ;;  %v1947_v37 = vadd.f32 %v645_v57, %v644_v3  ;;  %v692_v16 = vmul.f32 %v691_v23, %v1692_v47  ;;  %v693_v62 = vstv %s1906_s1  ;;  %s2184_s1 = sld [smem:[#allocation2 + $0x53]] }
  0xc6   :  { %v683_v35 = vadd.f32 %v682_v19, %v681_v18  ;;  %v1951_v17 = vadd.f32 %v650_v58, %v649_v30  ;;  %v694_v38 = vmul.f32 %v693_v62, %v1698_v50  ;;  %v696_v39 = vstv %s1912_s27  ;;  %s2191_s27 = sld [smem:[#allocation2 + $0x48]] }
  0xc7   :  { %818 = vst [vmem:[#allocation9 + $0x2] sm:$0x1] %v817_v36  ;;  %v686_v42 = vmul.f32 %v1878_v0, %v1947_v37  ;;  %v697_v6 = vmul.f32 %v696_v39, %v1704_v53  ;;  %v699_v45 = vmul.f32 %v691_v23, %v1694_v48  ;;  %v700_v24 = vmul.f32 %v693_v62, %v1700_v51 }
  0xc8   :  { %v1965_v5 = vadd.f32 %v683_v35, %v1805_v1  ;;  %v688_v46 = vmul.f32 %v1885_v25, %v1951_v17  ;;  %v695_v27 = vadd.f32 %v694_v38, %v692_v16  ;;  %v702_v55 = vmul.f32 %v696_v39, %v1706_v54 }
  0xc9   :  { %v687_v0 = vadd.f32 %v686_v42, %v685_v21  ;;  %v701_v28 = vadd.f32 %v700_v24, %v699_v45  ;;  %v704_v57 = vmul.f32 %v691_v23, %v1696_v49  ;;  %v705_v60 = vmul.f32 %v693_v62, %v1702_v52 }
  0xca   :  { %v819_v22 = vadd.f32 %v1965_v5, %v1495_v8  ;;  %v698_v7 = vadd.f32 %v697_v6, %v695_v27  ;;  %v707_v19 = vmul.f32 %v696_v39, %v1718_v4  ;;  %v709_v25 = vstv %s1931_s28  ;;  %s2196_s28 = sld [smem:[#allocation2 + $0x49]] }
  0xcb   :  { %v689_v3 = vadd.f32 %v688_v46, %v687_v0  ;;  %v703_v58 = vadd.f32 %v702_v55, %v701_v28  ;;  %v706_v18 = vadd.f32 %v705_v60, %v704_v57  ;;  %v710_v30 = vmul.f32 %v709_v25, %v1692_v47 }
  0xcc   :  { %820 = vst [vmem:[#allocation9 + $0xa] sm:$0x1] %v819_v22  ;;  %v711_v21 = vstv %s1939_s2  ;;  %v714_v36 = vstv %s1942_s29  ;;  %v717_v23 = vmul.f32 %v709_v25, %v1694_v48  ;;  %v722_v16 = vmul.f32 %v709_v25, %v1696_v49  ;;  %s2202_s2 = sld [smem:[#allocation2 + $0x4a]] }
  0xcd   :  { %v1984_v8 = vadd.f32 %v689_v3, %v1836_v34  ;;  %v708_v62 = vadd.f32 %v707_v19, %v706_v18  ;;  %v712_v35 = vmul.f32 %v711_v21, %v1698_v50  ;;  %v715_v38 = vmul.f32 %v714_v36, %v1704_v53  ;;  %s2217_s29 = sld [smem:[#allocation2 + $0x4c]] }
  0xce   :  { %v718_v39 = vmul.f32 %v711_v21, %v1700_v51  ;;  %v720_v42 = vmul.f32 %v714_v36, %v1706_v54  ;;  %v723_v6 = vmul.f32 %v711_v21, %v1702_v52  ;;  %v725_v45 = vmul.f32 %v714_v36, %v1718_v4 }
  0xcf   :  { %v821_v24 = vadd.f32 %v1984_v8, %v1499_v10  ;;  %v713_v46 = vadd.f32 %v712_v35, %v710_v30  ;;  %v727_v27 = vstv %s1953_s30  ;;  %v729_v55 = vstv %s1959_s4  ;;  %s2221_s30 = sld [smem:[#allocation2 + $0x4d]] }
  0xd0   :  { %v719_v0 = vadd.f32 %v718_v39, %v717_v23  ;;  %v724_v28 = vadd.f32 %v723_v6, %v722_v16  ;;  %v728_v57 = vmul.f32 %v727_v27, %v1692_v47  ;;  %v730_v60 = vmul.f32 %v729_v55, %v1698_v50  ;;  %s2226_s4 = sld [smem:[#allocation2 + $0x4e]] }
  0xd1   :  { %822 = vst [vmem:[#allocation9 + $0x12] sm:$0x1] %v821_v24  ;;  %v716_v22 = vadd.f32 %v715_v38, %v713_v46  ;;  %v732_v19 = vstv %s1970_s5  ;;  %v735_v25 = vmul.f32 %v727_v27, %v1694_v48  ;;  %v736_v3 = vmul.f32 %v729_v55, %v1700_v51  ;;  %s2229_s5 = sld [smem:[#allocation2 + $0x50]] }
  0xd2   :  { %v721_v10 = vadd.f32 %v720_v42, %v719_v0  ;;  %v726_v18 = vadd.f32 %v725_v45, %v724_v28  ;;  %v731_v30 = vadd.f32 %v730_v60, %v728_v57  ;;  %v733_v21 = vmul.f32 %v732_v19, %v1704_v53 }
  0xd3   :  { %v737_v36 = vadd.f32 %v736_v3, %v735_v25  ;;  %v738_v23 = vmul.f32 %v732_v19, %v1706_v54  ;;  %v740_v16 = vmul.f32 %v727_v27, %v1696_v49  ;;  %v741_v35 = vmul.f32 %v729_v55, %v1702_v52 }
  0xd4   :  { %v734_v38 = vadd.f32 %v733_v21, %v731_v30  ;;  %v743_v39 = vmul.f32 %v732_v19, %v1718_v4  ;;  %v746_v6 = vrot.slane %v698_v7, 2  ;;  %v750_v24 = vrot.slane %v716_v22, 2 }
  0xd5   :  { %v739_v46 = vadd.f32 %v738_v23, %v737_v36  ;;  %v742_v42 = vadd.f32 %v741_v35, %v740_v16  ;;  %v760_v45 = vrot.slane %v703_v58, 2  ;;  %v764_v0 = vrot.slane %v721_v10, 2 }
  0xd6   :  { %v748_v28 = vmul.f32 %v746_v6, %v1880_v20  ;;  %v752_v57 = vmul.f32 %v750_v24, %v1891_v2  ;;  %v755_v60 = vrot.slane %v734_v38, 2  ;;  %v774_v25 = vrot.slane %v708_v62, 2 }
  0xd7   :  { %v744_v27 = vadd.f32 %v743_v39, %v742_v42  ;;  %v762_v55 = vmul.f32 %v760_v45, %v1880_v20  ;;  %v766_v19 = vmul.f32 %v764_v0, %v1891_v2  ;;  %v769_v7 = vrot.slane %v739_v46, 2 }
  0xd8   :  { %v753_v22 = vadd.f32 %v752_v57, %v748_v28  ;;  %v757_v3 = vmul.f32 %v755_v60, %v1900_v56  ;;  %v776_v58 = vmul.f32 %v774_v25, %v1880_v20  ;;  %v778_v10 = vrot.slane %v726_v18, 2 }
  0xd9   :  { %v767_v30 = vadd.f32 %v766_v19, %v762_v55  ;;  %v771_v21 = vmul.f32 %v769_v7, %v1900_v56  ;;  %v783_v36 = vrot.slane %v744_v27, 2  ;;  %v826_v23 = vstv %s1998_s6  ;;  %s2238_s6 = sld [smem:[#allocation2 + $0x51]] }
  0xda   :  { %v758_v16 = vadd.f32 %v757_v3, %v753_v22  ;;  %v780_v62 = vmul.f32 %v778_v10, %v1891_v2  ;;  %v828_v35 = vstv %s2003_s7  ;;  %v2023_v38 = vstv %s2006_s8  ;;  %s2244_s7 = sld [smem:[#allocation2 + $0x52]] }
  0xdb   :  { %v772_v39 = vadd.f32 %v771_v21, %v767_v30  ;;  %v785_v46 = vmul.f32 %v783_v36, %v1900_v56  ;;  %v787_v42 = vmul.f32 %v746_v6, %v1908_v31  ;;  %v788_v28 = vmul.f32 %v750_v24, %v1917_v29  ;;  %s2277_s8 = sld [smem:[#allocation2 + $0x57]] }
  0xdc   :  { %v781_v57 = vadd.f32 %v780_v62, %v776_v58  ;;  %v827_v18 = vmul.f32 %v826_v23, %v758_v16  ;;  %v790_v55 = vmul.f32 %v755_v60, %v1921_v11  ;;  %v792_v27 = vmul.f32 %v760_v45, %v1908_v31 }
  0xdd   :  { %v829_v19 = vmul.f32 %v828_v35, %v772_v39  ;;  %v789_v22 = vadd.f32 %v788_v28, %v787_v42  ;;  %v793_v3 = vmul.f32 %v764_v0, %v1917_v29  ;;  %v795_v15 = vmul.f32 %v769_v7, %v1921_v11 }
  0xde   :  { %v786_v30 = vadd.f32 %v785_v46, %v781_v57  ;;  %v797_v21 = vmul.f32 %v774_v25, %v1908_v31  ;;  %v798_v13 = vmul.f32 %v778_v10, %v1917_v29  ;;  %v800_v58 = vmul.f32 %v783_v36, %v1921_v11 }
  0xdf   :  { %v830_v16 = vadd.f32 %v829_v19, %v827_v18  ;;  %v791_v62 = vadd.f32 %v790_v55, %v789_v22  ;;  %v794_v9 = vadd.f32 %v793_v3, %v792_v27  ;;  %v802_v39 = vmul.f32 %v746_v6, %v1927_v14 }
  0xe0   :  { %v832_v42 = vmul.f32 %v2023_v38, %v786_v30  ;;  %v799_v28 = vadd.f32 %v798_v13, %v797_v21  ;;  %v803_v43 = vmul.f32 %v750_v24, %v1947_v37  ;;  %v805_v46 = vmul.f32 %v755_v60, %v1951_v17 }
  0xe1   :  { %v796_v57 = vadd.f32 %v795_v15, %v794_v9  ;;  %v835_v41 = vmul.f32 %v826_v23, %v791_v62  ;;  %v807_v59 = vmul.f32 %v760_v45, %v1927_v14  ;;  %v808_v61 = vmul.f32 %v764_v0, %v1947_v37 }
  0xe2   :  { %v833_v18 = vadd.f32 %v832_v42, %v830_v16  ;;  %v801_v55 = vadd.f32 %v800_v58, %v799_v28  ;;  %v804_v27 = vadd.f32 %v803_v43, %v802_v39  ;;  %v810_v6 = vmul.f32 %v769_v7, %v1951_v17 }
  0xe3   :  { %v836_v19 = vmul.f32 %v828_v35, %v796_v57  ;;  %v809_v13 = vadd.f32 %v808_v61, %v807_v59  ;;  %v812_v24 = vmul.f32 %v774_v25, %v1927_v14  ;;  %v813_v60 = vmul.f32 %v778_v10, %v1947_v37  ;;  %v2060_v25 = vld [vmem:[#allocation7] sm:$0x1] }
  0xe4   :  { %v834_v9 = vadd.f32 %v833_v18, %v1934_v12  ;;  %v838_v15 = vmul.f32 %v2023_v38, %v801_v55  ;;  %v806_v45 = vadd.f32 %v805_v46, %v804_v27  ;;  %v815_v0 = vmul.f32 %v783_v36, %v1951_v17  ;;  %v2079_v27 = vld [vmem:[#allocation7 + $0x1] sm:$0x1] }
  0xe5   :  { %v837_v43 = vadd.f32 %v836_v19, %v835_v41  ;;  %v811_v7 = vadd.f32 %v810_v6, %v809_v13  ;;  %v814_v61 = vadd.f32 %v813_v60, %v812_v24  ;;  %v865_v59 = vstv %s2032_s9  ;;  %s2281_s9 = sld [smem:[#allocation2 + $0x5b]] }
  0xe6   :  { %v847_v10 = vadd.f32 %v2060_v25, %v834_v9  ;;  %v841_v22 = vmul.f32 %v826_v23, %v806_v45  ;;  %v866_v12 = vmul.f32 %v865_v59, %v1880_v20  ;;  %v867_v3 = vstv %s2037_s10  ;;  %s2287_s10 = sld [smem:[#allocation2 + $0x5f]] }
  0xe7   :  { %v839_v30 = vadd.f32 %v838_v15, %v837_v43  ;;  %v816_v21 = vadd.f32 %v815_v0, %v814_v61  ;;  %v842_v36 = vmul.f32 %v828_v35, %v811_v7  ;;  %v868_v58 = vmul.f32 %v867_v3, %v1891_v2 }
  0xe8   :  { %848 = vst [vmem:[#allocation9 + $0x3] sm:$0x1] %v847_v10  ;;  %v870_v41 = vstv %s2043_s11  ;;  %v874_v16 = vmul.f32 %v865_v59, %v1908_v31  ;;  %v875_v62 = vmul.f32 %v867_v3, %v1917_v29  ;;  %v880_v39 = vmul.f32 %v865_v59, %v1927_v14  ;;  %s1460_s11 = smov [#allocation9]  }
  0xe9   :  { %v840_v42 = vadd.f32 %v839_v30, %v1965_v5  ;;  %v843_v23 = vadd.f32 %v842_v36, %v841_v22  ;;  %v844_v28 = vmul.f32 %v2023_v38, %v816_v21  ;;  %v869_v46 = vadd.f32 %v868_v58, %v866_v12  ;;  %v2102_v22 = vld [vmem:[#allocation7 + $0x2] sm:$0x1] }
  0xea   :  { %v871_v35 = vmul.f32 %v870_v41, %v1900_v56  ;;  %v876_v57 = vadd.f32 %v875_v62, %v874_v16  ;;  %v877_v18 = vmul.f32 %v870_v41, %v1921_v11  ;;  %v881_v55 = vmul.f32 %v867_v3, %v1947_v37 }
  0xeb   :  { %v849_v5 = vadd.f32 %v2079_v27, %v840_v42  ;;  %v845_v6 = vadd.f32 %v844_v28, %v843_v23  ;;  %v883_v38 = vmul.f32 %v870_v41, %v1951_v17  ;;  %v886_v19 = vstv %s2050_s12  ;;  %s1247_s12 = sshll.u32 %s1460_s11, 4  ;;  %s1248_s12 = int_to_ptr.vmem [resolvable:$true] %s1247_s12 }
  0xec   :  { %v872_v13 = vadd.f32 %v871_v35, %v869_v46  ;;  %v878_v24 = vadd.f32 %v877_v18, %v876_v57  ;;  %v882_v60 = vadd.f32 %v881_v55, %v880_v39  ;;  %v887_v9 = vmul.f32 %v886_v19, %v1692_v47 }
  0xed   :  { %850 = vst [vmem:[#allocation9 + $0xb] sm:$0x1] %v849_v5  ;;  %v846_v15 = vadd.f32 %v845_v6, %v1984_v8  ;;  %v888_v45 = vstv %s2055_s13  ;;  %v891_v0 = vstv %s2058_s14  ;;  %v894_v43 = vmul.f32 %v886_v19, %v1694_v48 }
  0xee   :  { %v2094_v7 = vadd.f32 %v872_v13, %v1784_v63  ;;  %v2097_v61 = vadd.f32 %v878_v24, %v1805_v1  ;;  %v884_v59 = vadd.f32 %v883_v38, %v882_v60  ;;  %v889_v10 = vmul.f32 %v888_v45, %v1698_v50 }
  0xef   :  { %v851_v8 = vadd.f32 %v2102_v22, %v846_v15  ;;  %v892_v12 = vmul.f32 %v891_v0, %v1704_v53  ;;  %v895_v63 = vmul.f32 %v888_v45, %v1700_v51  ;;  %v897_v1 = vmul.f32 %v891_v0, %v1706_v54 }
  0xf0   :  { %v1012_v3 = vadd.f32 %v2060_v25, %v2094_v7  ;;  %v1014_v30 = vadd.f32 %v2079_v27, %v2097_v61  ;;  %v2115_v21 = vadd.f32 %v884_v59, %v1836_v34  ;;  %v890_v36 = vadd.f32 %v889_v10, %v887_v9 }
  0xf1   :  { %852 = vst [vmem:[#allocation9 + $0x13] sm:$0x1] %v851_v8  ;;  %v896_v58 = vadd.f32 %v895_v63, %v894_v43  ;;  %v899_v41 = vmul.f32 %v886_v19, %v1696_v49  ;;  %v900_v16 = vmul.f32 %v888_v45, %v1702_v52  ;;  %v902_v62 = vmul.f32 %v891_v0, %v1718_v4 }
  0xf2   :  { %1013 = vst [vmem:[#allocation9 + $0x4] sm:$0x1] %v1012_v3  ;;  %v1016_v39 = vadd.f32 %v2102_v22, %v2115_v21  ;;  %v893_v42 = vadd.f32 %v892_v12, %v890_v36  ;;  %v904_v23 = vstv %s2072_s15  ;;  %v906_v28 = vstv %s2077_s16  ;;  %s1249_s15 = sshll.u32 %s2336_s3, 4  ;;  %s1250_s15 = int_to_ptr.hbm [resolvable:$true] %s1249_s15 }
  0xf3   :  { %1015 = vst [vmem:[#allocation9 + $0xc] sm:$0x1] %v1014_v30  ;;  %v898_v34 = vadd.f32 %v897_v1, %v896_v58  ;;  %v901_v46 = vadd.f32 %v900_v16, %v899_v41  ;;  %v905_v35 = vmul.f32 %v904_v23, %v1692_v47  ;;  %v907_v57 = vmul.f32 %v906_v28, %v1698_v50 }
  0xf4   :  { %1017 = vst [vmem:[#allocation9 + $0x14] sm:$0x1] %v1016_v39  ;;  %v909_v18 = vstv %s2084_s17  ;;  %v912_v55 = vmul.f32 %v904_v23, %v1694_v48  ;;  %v913_v5 = vmul.f32 %v906_v28, %v1700_v51  ;;  %v917_v6 = vmul.f32 %v904_v23, %v1696_v49 }
  0xf5   :  { %v903_v38 = vadd.f32 %v902_v62, %v901_v46  ;;  %v908_v19 = vadd.f32 %v907_v57, %v905_v35  ;;  %v910_v13 = vmul.f32 %v909_v18, %v1704_v53  ;;  %v915_v24 = vmul.f32 %v909_v18, %v1706_v54 }
  0xf6   :  { %v914_v60 = vadd.f32 %v913_v5, %v912_v55  ;;  %v918_v9 = vmul.f32 %v906_v28, %v1702_v52  ;;  %v920_v15 = vmul.f32 %v909_v18, %v1718_v4  ;;  %v922_v45 = vstv %s2088_s18 }
  0xf7   :  { %v911_v0 = vadd.f32 %v910_v13, %v908_v19  ;;  %v923_v43 = vmul.f32 %v922_v45, %v1692_v47  ;;  %v924_v59 = vstv %s2099_s19  ;;  %v927_v10 = vstv %s2105_s20 }
  0xf8   :  { %v916_v8 = vadd.f32 %v915_v24, %v914_v60  ;;  %v919_v12 = vadd.f32 %v918_v9, %v917_v6  ;;  %v925_v63 = vmul.f32 %v924_v59, %v1698_v50  ;;  %v928_v1 = vmul.f32 %v927_v10, %v1704_v53 }
  0xf9   :  { %v930_v3 = vmul.f32 %v922_v45, %v1694_v48  ;;  %v931_v30 = vmul.f32 %v924_v59, %v1700_v51  ;;  %v933_v36 = vmul.f32 %v927_v10, %v1706_v54  ;;  %v935_v58 = vmul.f32 %v922_v45, %v1696_v49 }
  0xfa   :  { %v921_v41 = vadd.f32 %v920_v15, %v919_v12  ;;  %v926_v16 = vadd.f32 %v925_v63, %v923_v43  ;;  %v936_v62 = vmul.f32 %v924_v59, %v1702_v52  ;;  %v938_v39 = vmul.f32 %v927_v10, %v1718_v4 }
  0xfb   :  { %v932_v23 = vadd.f32 %v931_v30, %v930_v3  ;;  %v941_v28 = vrot.slane %v893_v42, 4  ;;  %v945_v46 = vrot.slane %v911_v0, 4  ;;  %v955_v35 = vrot.slane %v898_v34, 4 }
  0xfc   :  { %v929_v57 = vadd.f32 %v928_v1, %v926_v16  ;;  %v937_v18 = vadd.f32 %v936_v62, %v935_v58  ;;  %v959_v55 = vrot.slane %v916_v8, 4  ;;  %v969_v5 = vrot.slane %v903_v38, 4 }
  0xfd   :  { %v934_v6 = vadd.f32 %v933_v36, %v932_v23  ;;  %v943_v19 = vmul.f32 %v941_v28, %v1880_v20  ;;  %v947_v13 = vmul.f32 %v945_v46, %v1891_v2  ;;  %v957_v24 = vmul.f32 %v955_v35, %v1880_v20 }
  0xfe   :  { %v939_v60 = vadd.f32 %v938_v39, %v937_v18  ;;  %v950_v9 = vrot.slane %v929_v57, 4  ;;  %v961_v42 = vmul.f32 %v959_v55, %v1891_v2  ;;  %v971_v34 = vmul.f32 %v969_v5, %v1880_v20 }
  0xff   :  { %v948_v15 = vadd.f32 %v947_v13, %v943_v19  ;;  %v964_v45 = vrot.slane %v934_v6, 4  ;;  %v973_v0 = vrot.slane %v921_v41, 4  ;;  %v1021_v43 = vstv %s2138_s23 }
 0x100   :  { %v952_v38 = vmul.f32 %v950_v9, %v1900_v56  ;;  %v962_v59 = vadd.f32 %v961_v42, %v957_v24  ;;  %v978_v10 = vrot.slane %v939_v60, 4  ;;  %v2160_v8 = vstv %s2142_s24 }
 0x101   :  { %v966_v12 = vmul.f32 %v964_v45, %v1900_v56  ;;  %v975_v63 = vmul.f32 %v973_v0, %v1891_v2  ;;  %v2165_v1 = vstv %s2148_s0  ;;  %v982_v3 = vmul.f32 %v941_v28, %v1908_v31 }
 0x102   :  { %v953_v30 = vadd.f32 %v952_v38, %v948_v15  ;;  %v980_v20 = vmul.f32 %v978_v10, %v1900_v56  ;;  %v983_v36 = vmul.f32 %v945_v46, %v1917_v29  ;;  %v985_v58 = vmul.f32 %v950_v9, %v1921_v11 }
 0x103   :  { %v967_v41 = vadd.f32 %v966_v12, %v962_v59  ;;  %v976_v16 = vadd.f32 %v975_v63, %v971_v34  ;;  %v987_v62 = vmul.f32 %v955_v35, %v1908_v31  ;;  %v988_v39 = vmul.f32 %v959_v55, %v1917_v29 }
 0x104   :  { %v1022_v23 = vmul.f32 %v1021_v43, %v953_v30  ;;  %v984_v57 = vadd.f32 %v983_v36, %v982_v3  ;;  %v990_v2 = vmul.f32 %v964_v45, %v1921_v11  ;;  %v992_v18 = vmul.f32 %v969_v5, %v1908_v31 }
 0x105   :  { %v981_v6 = vadd.f32 %v980_v20, %v976_v16  ;;  %v1024_v56 = vmul.f32 %v2160_v8, %v967_v41  ;;  %v989_v19 = vadd.f32 %v988_v39, %v987_v62  ;;  %v993_v13 = vmul.f32 %v973_v0, %v1917_v29 }
 0x106   :  { %v986_v24 = vadd.f32 %v985_v58, %v984_v57  ;;  %v995_v60 = vmul.f32 %v978_v10, %v1921_v11  ;;  %v997_v42 = vmul.f32 %v941_v28, %v1927_v14  ;;  %v998_v34 = vmul.f32 %v945_v46, %v1947_v37 }
 0x107   :  { %v1025_v31 = vadd.f32 %v1024_v56, %v1022_v23  ;;  %v1027_v15 = vmul.f32 %v2165_v1, %v981_v6  ;;  %v991_v38 = vadd.f32 %v990_v2, %v989_v19  ;;  %v994_v59 = vadd.f32 %v993_v13, %v992_v18  ;;  %v2357_v13 = vld [vmem:[#allocation17_spill] sm:$0xff] }
 0x108   :  { %v1030_v12 = vmul.f32 %v1021_v43, %v986_v24  ;;  %v999_v63 = vadd.f32 %v998_v34, %v997_v42  ;;  %v1000_v29 = vmul.f32 %v950_v9, %v1951_v17  ;;  %v1002_v3 = vmul.f32 %v955_v35, %v1927_v14 }
 0x109   :  { %v1028_v30 = vadd.f32 %v1027_v15, %v1025_v31  ;;  %v996_v20 = vadd.f32 %v995_v60, %v994_v59  ;;  %v1031_v11 = vmul.f32 %v2160_v8, %v991_v38  ;;  %v1003_v28 = vmul.f32 %v959_v55, %v1947_v37  ;;  %v2358_v60 = vld [vmem:[#allocation18_spill] sm:$0xff]  ;;  %v2360_v59 = vld [vmem:[#allocation20_spill] sm:$0xff] }
 0x10a   :  { %v1001_v46 = vadd.f32 %v1000_v29, %v999_v63  ;;  %v1005_v36 = vmul.f32 %v964_v45, %v1951_v17  ;;  %v1007_v58 = vmul.f32 %v969_v5, %v1927_v14  ;;  %v1008_v41 = vmul.f32 %v973_v0, %v1947_v37 }
 0x10b   :  { %v1029_v35 = vadd.f32 %v1028_v30, %v2094_v7  ;;  %v1032_v9 = vadd.f32 %v1031_v11, %v1030_v12  ;;  %v1033_v16 = vmul.f32 %v2165_v1, %v996_v20  ;;  %v1004_v62 = vadd.f32 %v1003_v28, %v1002_v3 }
 0x10c   :  { %v1009_v55 = vadd.f32 %v1008_v41, %v1007_v58  ;;  %v1010_v39 = vmul.f32 %v978_v10, %v1951_v17  ;;  %v1036_v23 = vmul.f32 %v1021_v43, %v1001_v46  ;;  %v1060_v57 = vstv %s2175_s25  ;;  %v2361_v41 = vld [vmem:[#allocation14_spill] sm:$0xff] }
 0x10d   :  { %v1042_v14 = vadd.f32 %v2060_v25, %v1029_v35  ;;  %v1034_v37 = vadd.f32 %v1033_v16, %v1032_v9  ;;  %v1006_v5 = vadd.f32 %v1005_v36, %v1004_v62  ;;  %v1061_v45 = vmul.f32 %v1060_v57, %v1729_v32  ;;  %v2362_v62 = vld [vmem:[#allocation15_spill] sm:$0xff] }
 0x10e   :  { %v1011_v0 = vadd.f32 %v1010_v39, %v1009_v55  ;;  %v1062_v2 = vstv %s2179_s26  ;;  %v1065_v7 = vstv %s2184_s1  ;;  %v1069_v18 = vmul.f32 %v1060_v57, %v1749_v44 }
 0x10f   :  { %1043 = vst [vmem:[#allocation9 + $0x5] sm:$0x1] %v1042_v14  ;;  %v1035_v6 = vadd.f32 %v1034_v37, %v2097_v61  ;;  %v1037_v17 = vmul.f32 %v2160_v8, %v1006_v5  ;;  %v1063_v43 = vmul.f32 %v1062_v2, %v1735_v33  ;;  %v1066_v10 = vmul.f32 %v1065_v7, %v1741_v40  ;;  %v2359_v8 = vld [vmem:[#allocation19_spill] sm:$0xff]  ;;  %v2363_v37 = vld [vmem:[#allocation16_spill] sm:$0xff] }
 0x110   :  { %v1039_v56 = vmul.f32 %v2165_v1, %v1011_v0  ;;  %v1070_v19 = vmul.f32 %v1062_v2, %v1757_v26  ;;  %v1072_v24 = vmul.f32 %v1065_v7, %v2357_v13  ;;  %v1075_v42 = vmul.f32 %v1060_v57, %v2358_v60 }
 0x111   :  { %v1044_v61 = vadd.f32 %v2079_v27, %v1035_v6  ;;  %v1038_v34 = vadd.f32 %v1037_v17, %v1036_v23  ;;  %v1064_v31 = vadd.f32 %v1063_v43, %v1061_v45  ;;  %v1076_v15 = vmul.f32 %v1062_v2, %v2359_v8 }
 0x112   :  { %v1071_v38 = vadd.f32 %v1070_v19, %v1069_v18  ;;  %v1078_v1 = vmul.f32 %v1065_v7, %v2360_v59  ;;  %v1081_v12 = vstv %s2191_s27  ;;  %v1083_v63 = vstv %s2196_s28 }
 0x113   :  { %1045 = vst [vmem:[#allocation9 + $0xd] sm:$0x1] %v1044_v61  ;;  %v1040_v29 = vadd.f32 %v1039_v56, %v1038_v34  ;;  %v1067_v3 = vadd.f32 %v1066_v10, %v1064_v31  ;;  %v1077_v30 = vadd.f32 %v1076_v15, %v1075_v42  ;;  %v1082_v20 = vmul.f32 %v1081_v12, %v1692_v47 }
 0x114   :  { %v1073_v11 = vadd.f32 %v1072_v24, %v1071_v38  ;;  %v1084_v28 = vmul.f32 %v1083_v63, %v1698_v50  ;;  %v1086_v46 = vstv %s2202_s2  ;;  %v1089_v36 = vmul.f32 %v1081_v12, %v1694_v48 }
 0x115   :  { %v1041_v58 = vadd.f32 %v1040_v29, %v2115_v21  ;;  %v2236_v35 = vadd.f32 %v1067_v3, %v2361_v41  ;;  %v1079_v9 = vadd.f32 %v1078_v1, %v1077_v30  ;;  %v1087_v16 = vmul.f32 %v1086_v46, %v1704_v53 }
 0x116   :  { %v2242_v55 = vadd.f32 %v1073_v11, %v2362_v62  ;;  %v1085_v39 = vadd.f32 %v1084_v28, %v1082_v20  ;;  %v1090_v23 = vmul.f32 %v1083_v63, %v1700_v51  ;;  %v1092_v21 = vmul.f32 %v1086_v46, %v1706_v54 }
 0x117   :  { %v1046_v57 = vadd.f32 %v2102_v22, %v1041_v58  ;;  %v1207_v14 = vadd.f32 %v2060_v25, %v2236_v35  ;;  %v2252_v5 = vadd.f32 %v1079_v9, %v2363_v37  ;;  %v1094_v45 = vmul.f32 %v1081_v12, %v1696_v49 }
 0x118   :  { %v1209_v0 = vadd.f32 %v2079_v27, %v2242_v55  ;;  %v1088_v2 = vadd.f32 %v1087_v16, %v1085_v39  ;;  %v1091_v7 = vadd.f32 %v1090_v23, %v1089_v36  ;;  %v1095_v18 = vmul.f32 %v1083_v63, %v1702_v52 }
 0x119   :  { %1047 = vst [vmem:[#allocation9 + $0x15] sm:$0x1] %v1046_v57  ;;  %v1211_v6 = vadd.f32 %v2102_v22, %v2252_v5  ;;  %v1097_v17 = vmul.f32 %v1086_v46, %v1718_v4  ;;  %v1099_v43 = vstv %s2217_s29  ;;  %v1101_v10 = vstv %s2221_s30 }
 0x11a   :  { %1208 = vst [vmem:[#allocation9 + $0x6] sm:$0x1] %v1207_v14  ;;  %v1093_v56 = vadd.f32 %v1092_v21, %v1091_v7  ;;  %v1096_v19 = vadd.f32 %v1095_v18, %v1094_v45  ;;  %v1100_v24 = vmul.f32 %v1099_v43, %v1692_v47  ;;  %v1102_v42 = vmul.f32 %v1101_v10, %v1698_v50 }
 0x11b   :  { %1210 = vst [vmem:[#allocation9 + $0xe] sm:$0x1] %v1209_v0  ;;  %v1104_v61 = vstv %s2226_s4  ;;  %v1107_v34 = vmul.f32 %v1099_v43, %v1694_v48  ;;  %v1108_v31 = vmul.f32 %v1101_v10, %v1700_v51  ;;  %v1112_v15 = vmul.f32 %v1099_v43, %v1696_v49 }
 0x11c   :  { %1212 = vst [vmem:[#allocation9 + $0x16] sm:$0x1] %v1211_v6  ;;  %v1098_v38 = vadd.f32 %v1097_v17, %v1096_v19  ;;  %v1103_v1 = vadd.f32 %v1102_v42, %v1100_v24  ;;  %v1105_v12 = vmul.f32 %v1104_v61, %v1704_v53  ;;  %v1110_v63 = vmul.f32 %v1104_v61, %v1706_v54 }
 0x11d   :  { %v1109_v29 = vadd.f32 %v1108_v31, %v1107_v34  ;;  %v1113_v3 = vmul.f32 %v1101_v10, %v1702_v52  ;;  %v1115_v30 = vmul.f32 %v1104_v61, %v1718_v4  ;;  %v1117_v20 = vstv %s2229_s5 }
 0x11e   :  { %v1106_v11 = vadd.f32 %v1105_v12, %v1103_v1  ;;  %v1118_v28 = vmul.f32 %v1117_v20, %v1692_v47  ;;  %v1119_v46 = vstv %s2238_s6  ;;  %v1122_v36 = vstv %s2244_s7 }
 0x11f   :  { %v1111_v58 = vadd.f32 %v1110_v63, %v1109_v29  ;;  %v1114_v41 = vadd.f32 %v1113_v3, %v1112_v15  ;;  %v1120_v9 = vmul.f32 %v1119_v46, %v1698_v50  ;;  %v1123_v16 = vmul.f32 %v1122_v36, %v1704_v53 }
 0x120   :  { %v1125_v62 = vmul.f32 %v1117_v20, %v1694_v48  ;;  %v1126_v39 = vmul.f32 %v1119_v46, %v1700_v51  ;;  %v1128_v23 = vmul.f32 %v1122_v36, %v1706_v54  ;;  %v1130_v47 = vmul.f32 %v1117_v20, %v1696_v49 }
 0x121   :  { %v1116_v21 = vadd.f32 %v1115_v30, %v1114_v41  ;;  %v1121_v57 = vadd.f32 %v1120_v9, %v1118_v28  ;;  %v1131_v14 = vmul.f32 %v1119_v46, %v1702_v52  ;;  %v1133_v50 = vmul.f32 %v1122_v36, %v1718_v4 }
 0x122   :  { %v1127_v37 = vadd.f32 %v1126_v39, %v1125_v62  ;;  %v1136_v53 = vrot.slane %v1088_v2, 6  ;;  %v1140_v45 = vrot.slane %v1106_v11, 6  ;;  %v1150_v0 = vrot.slane %v1093_v56, 6 }
 0x123   :  { %v1124_v48 = vadd.f32 %v1123_v16, %v1121_v57  ;;  %v1132_v7 = vadd.f32 %v1131_v14, %v1130_v47  ;;  %v1154_v51 = vrot.slane %v1111_v58, 6  ;;  %v1164_v18 = vrot.slane %v1098_v38, 6 }
 0x124   :  { %v1129_v54 = vadd.f32 %v1128_v23, %v1127_v37  ;;  %v1138_v49 = vmul.f32 %v1136_v53, %v1729_v32  ;;  %v1142_v6 = vmul.f32 %v1140_v45, %v1735_v33  ;;  %v1152_v52 = vmul.f32 %v1150_v0, %v1729_v32 }
 0x125   :  { %v1134_v17 = vadd.f32 %v1133_v50, %v1132_v7  ;;  %v1145_v4 = vrot.slane %v1124_v48, 6  ;;  %v1156_v2 = vmul.f32 %v1154_v51, %v1735_v33  ;;  %v1166_v43 = vmul.f32 %v1164_v18, %v1729_v32 }
 0x126   :  { %v1143_v10 = vadd.f32 %v1142_v6, %v1138_v49  ;;  %v1159_v56 = vrot.slane %v1129_v54, 6  ;;  %v1168_v19 = vrot.slane %v1116_v21, 6  ;;  %v1216_v24 = vstv %s2277_s8 }
 0x127   :  { %v1147_v42 = vmul.f32 %v1145_v4, %v1741_v40  ;;  %v1157_v61 = vadd.f32 %v1156_v2, %v1152_v52  ;;  %v1173_v34 = vrot.slane %v1134_v17, 6  ;;  %v1218_v31 = vstv %s2281_s9 }
 0x128   :  { %v1161_v15 = vmul.f32 %v1159_v56, %v1741_v40  ;;  %v1170_v38 = vmul.f32 %v1168_v19, %v1735_v33  ;;  %v1221_v1 = vstv %s2287_s10  ;;  %v1177_v12 = vmul.f32 %v1136_v53, %v1749_v44 }
 0x129   :  { %v1148_v63 = vadd.f32 %v1147_v42, %v1143_v10  ;;  %v1175_v29 = vmul.f32 %v1173_v34, %v1741_v40  ;;  %v1178_v32 = vmul.f32 %v1140_v45, %v1757_v26  ;;  %v1180_v3 = vmul.f32 %v1145_v4, %v2357_v13 }
 0x12a   :  { %v1162_v30 = vadd.f32 %v1161_v15, %v1157_v61  ;;  %v1171_v20 = vadd.f32 %v1170_v38, %v1166_v43  ;;  %v1182_v11 = vmul.f32 %v1150_v0, %v1749_v44  ;;  %v1183_v28 = vmul.f32 %v1154_v51, %v1757_v26 }
 0x12b   :  { %v1217_v46 = vmul.f32 %v1216_v24, %v1148_v63  ;;  %v1179_v36 = vadd.f32 %v1178_v32, %v1177_v12  ;;  %v1185_v33 = vmul.f32 %v1159_v56, %v2357_v13  ;;  %v1187_v58 = vmul.f32 %v1164_v18, %v1749_v44 }
 0x12c   :  { %v1176_v41 = vadd.f32 %v1175_v29, %v1171_v20  ;;  %v1219_v9 = vmul.f32 %v1218_v31, %v1162_v30  ;;  %v1184_v16 = vadd.f32 %v1183_v28, %v1182_v11  ;;  %v1188_v40 = vmul.f32 %v1168_v19, %v1757_v26 }
 0x12d   :  { %v1181_v62 = vadd.f32 %v1180_v3, %v1179_v36  ;;  %v1190_v39 = vmul.f32 %v1173_v34, %v2357_v13  ;;  %v1192_v23 = vmul.f32 %v1136_v53, %v2358_v60  ;;  %v1193_v47 = vmul.f32 %v1140_v45, %v2359_v8 }
 0x12e   :  { %v1220_v21 = vadd.f32 %v1219_v9, %v1217_v46  ;;  %v1222_v57 = vmul.f32 %v1221_v1, %v1176_v41  ;;  %v1186_v14 = vadd.f32 %v1185_v33, %v1184_v16  ;;  %v1189_v50 = vadd.f32 %v1188_v40, %v1187_v58 }
 0x12f   :  { %v1225_v37 = vmul.f32 %v1216_v24, %v1181_v62  ;;  %v1194_v48 = vadd.f32 %v1193_v47, %v1192_v23  ;;  %v1195_v44 = vmul.f32 %v1145_v4, %v2360_v59  ;;  %v1197_v7 = vmul.f32 %v1150_v0, %v2358_v60 }
 0x130   :  { %v1223_v54 = vadd.f32 %v1222_v57, %v1220_v21  ;;  %v1191_v49 = vadd.f32 %v1190_v39, %v1189_v50  ;;  %v1226_v26 = vmul.f32 %v1218_v31, %v1186_v14  ;;  %v1198_v6 = vmul.f32 %v1154_v51, %v2359_v8 }
 0x131   :  { %v1196_v13 = vadd.f32 %v1195_v44, %v1194_v48  ;;  %v1200_v53 = vmul.f32 %v1159_v56, %v2360_v59  ;;  %v1202_v45 = vmul.f32 %v1164_v18, %v2358_v60  ;;  %v1203_v52 = vmul.f32 %v1168_v19, %v2359_v8 }
 0x132   :  { %v1224_v17 = vadd.f32 %v1223_v54, %v2236_v35  ;;  %v1227_v2 = vadd.f32 %v1226_v26, %v1225_v37  ;;  %v1228_v43 = vmul.f32 %v1221_v1, %v1191_v49  ;;  %v1199_v10 = vadd.f32 %v1198_v6, %v1197_v7 }
 0x133   :  { %v1204_v4 = vadd.f32 %v1203_v52, %v1202_v45  ;;  %v1205_v0 = vmul.f32 %v1173_v34, %v2360_v59  ;;  %v1231_v51 = vmul.f32 %v1216_v24, %v1196_v13 }
 0x134   :  { %v1237_v42 = vadd.f32 %v2060_v25, %v1224_v17  ;;  %v1229_v61 = vadd.f32 %v1228_v43, %v1227_v2  ;;  %v1201_v15 = vadd.f32 %v1200_v53, %v1199_v10 }
 0x135   :  { %v1206_v38 = vadd.f32 %v1205_v0, %v1204_v4 }
 0x136   :  { %1238 = vst [vmem:[#allocation9 + $0x7] sm:$0x1] %v1237_v42  ;;  %v1230_v56 = vadd.f32 %v1229_v61, %v2242_v55  ;;  %v1232_v60 = vmul.f32 %v1218_v31, %v1201_v15 }
 0x137   :  { %v1234_v18 = vmul.f32 %v1221_v1, %v1206_v38 }
 0x138   :  { %v1239_v8 = vadd.f32 %v2079_v27, %v1230_v56  ;;  %v1233_v35 = vadd.f32 %v1232_v60, %v1231_v51 }
 0x13a   :  { %1240 = vst [vmem:[#allocation9 + $0xf] sm:$0x1] %v1239_v8  ;;  %v1235_v19 = vadd.f32 %v1234_v18, %v1233_v35 }
 0x13c   :  { %v1236_v25 = vadd.f32 %v1235_v19, %v2252_v5 }
 0x13e   :  { %v1241_v59 = vadd.f32 %v2102_v22, %v1236_v25 }
 0x140   :  { %1242 = vst [vmem:[#allocation9 + $0x17] sm:$0x1] %v1241_v59 }
 0x141   :  { %1255 = dma.vmem_to_hbm [thread:$0]  %s1248_s12, 384, %s1250_s15, [#allocation4], %s1450_s21, %s1450_s21, %s1451_s22  }
 0x142   :  { %1446 = dma.done.wait [#allocation4], 384  }
 0x143   :  { %1447 = vsyncadd [#allocation4], 4294966912 }
 0x144   :  { %1260 = vsyncpa [#allocation3], 1 }
 0x145   :  { %1261 = vsyncpa [#allocation8], 1 }
 0x146   :  { %1262 = vsyncpa [#allocation4], 1 }
 0x147   :  { %1263 = vsyncpa [#allocation5], 1 }

</bundles_post_ra>
